<compile_context>
chip_gen: v7x
topology: tpu7x:2x2x1
jax: 0.10.0
libtpu: 0.0.40
codegen_flags: <defaults>
</compile_context>

<pallas_src>
import jax
import jax.numpy as jnp
from jax.experimental import pallas as pl
from jax.experimental.pallas import tpu as pltpu


# ----------------------------------------------------------------------------
# Fused Pallas kernel
# ----------------------------------------------------------------------------
def _make_fused_kernel(cins, couts, num_heads, bn_flags, eps=1e-5):
    """Build the fused forward kernel body.

    Refs: x [N, Cin0] f32, nadj [N, N] f32 ((adj+I)/deg),
          wslab [L, Cin_max, W_max] bf16 (per layer [wlin | wu], zero padded),
          pslab [L, 4, C_max] f32 (rows: c, bias, gamma, beta; zero padded),
          out [N, Cout_last] f32.
    """
    n_layers = len(couts)
    H = num_heads

    def kernel(x_ref, nadj_ref, wslab_ref, pslab_ref, out_ref):
        nadj3 = nadj_ref[...][None, :, :]          # [1, N, N] normalized adjacency (f32)
        h_cur = x_ref[...]                         # current activation, f32

        for li in range(n_layers):
            cin, cout = cins[li], couts[li]

            # --- unpack packed parameter slabs (static slices) -------------------
            w_all = wslab_ref[li]                  # [Cin_max, W_max] bf16
            wproj = w_all[0:cin, :]                # [cin, W_max]; cols [0,H*cout)=wlin, [H*cout,H*cout+H)=wu
            p_all = pslab_ref[li]                  # [4, C_max] f32
            c_row = p_all[0:1, 0:H]                # [1, H]
            bias_row = p_all[1:2, 0:cout]          # [1, cout]

            # --- merged projection: one MXU push gives xw AND ux -----------------
            xb = h_cur.astype(jnp.bfloat16)
            proj = jnp.dot(xb, wproj, preferred_element_type=jnp.float32)   # [N, W_max]
            ux = proj[:, H * cout:H * cout + H]    # [N, H]   (u_h . x_i)
            ux_c = ux + c_row                      # fold c once

            # --- attention logits on a [H, N, N] slab -----------------------------
            # logits[h, i, j] = u_h.x_i + c_h - u_h.x_j   (translation-invariant form)
            uxT = jnp.transpose(ux)                # [H, N]
            uxcT = jnp.transpose(ux_c)             # [H, N]
            logits = uxcT[:, :, None] - uxT[:, None, :]        # [H, N, N]

            # softmax over heads = reduction over the LEADING axis (pure VPU across tiles)
            m = jnp.max(logits, axis=0, keepdims=True)         # [1, N, N]
            e = jnp.exp(logits - m)                            # [H, N, N]  (one EUP pass)
            denom = jnp.sum(e, axis=0, keepdims=True)          # [1, N, N]  (>= 1)
            alpha_mask = pl.reciprocal(denom, approx=True) * nadj3   # hoisted 1/denom * adj
            p = (e * alpha_mask).astype(jnp.bfloat16)          # [H, N, N]  masked attention

            # --- aggregation: H chained tiny matmuls (MRB-friendly on v7x) --------
            acc = None
            for h in range(H):
                xw_h = proj[:, h * cout:(h + 1) * cout].astype(jnp.bfloat16)  # [N, cout]
                d = jnp.dot(p[h], xw_h, preferred_element_type=jnp.float32)   # [N, cout]
                acc = d if acc is None else acc + d
            h_new = acc + bias_row

            # --- ReLU + BatchNorm (all but last layer) ----------------------------
            if li < n_layers - 1:
                h_new = jnp.maximum(h_new, 0.0)
                if bn_flags[li]:
                    gamma = p_all[2:3, 0:cout]
                    beta = p_all[3:4, 0:cout]
                    mean = jnp.mean(h_new, axis=0, keepdims=True)
                    ctr = h_new - mean
                    var = jnp.mean(ctr * ctr, axis=0, keepdims=True)   # two-pass (stable)
                    h_new = ctr * jax.lax.rsqrt(var + eps) * gamma + beta
            h_cur = h_new

        out_ref[...] = h_cur.astype(out_ref.dtype)

    return kernel


# ----------------------------------------------------------------------------
# Glue: parameter init, packing, adjacency construction, encoder driver
# ----------------------------------------------------------------------------
def init_params(key, in_features, conv_channels, num_heads, apply_batch_norm=True):
    channels = [in_features] + list(conv_channels)
    params = []
    n_layers = len(conv_channels)
    for li, (cin, cout) in enumerate(zip(channels[:-1], channels[1:])):
        key, k1, k2, k3, k4 = jax.random.split(key, 5)
        # torch: nn.Linear(cin, cout*H, bias=False).weight ~ U(0,1), shape (cout*H, cin).
        # Output index o = h*cout + c, so W_jax = W_torch.T puts head h in columns
        # [h*cout : (h+1)*cout] of a [cin, H*cout] matrix.
        wlin_torch = jax.random.uniform(k1, (cout * num_heads, cin), jnp.float32)
        wlin = jnp.transpose(wlin_torch)                                        # [cin, H*cout]
        # torch: u.weight ~ U(0,1), shape (H, cin)  ->  [cin, H]
        wu = jnp.transpose(jax.random.uniform(k2, (num_heads, cin), jnp.float32))
        # torch: c ~ N(0, 0.1), bias ~ N(0, 0.1)
        c = 0.1 * jax.random.normal(k3, (num_heads,), jnp.float32)
        bias = 0.1 * jax.random.normal(k4, (1, cout), jnp.float32)
        bn = None
        if apply_batch_norm and li < n_layers - 1:
            bn = (jnp.ones((1, cout), jnp.float32), jnp.zeros((1, cout), jnp.float32))
        params.append(dict(wu=wu, wlin=wlin, c=c, bias=bias, bn=bn))
    return params


def pack_params(params, num_heads):
    """Pack per-layer parameters into one bf16 weight slab and one f32 vector slab."""
    cins = [p["wlin"].shape[0] for p in params]
    couts = [p["bias"].shape[-1] for p in params]
    n_layers = len(params)
    widths = [num_heads * c + num_heads for c in couts]
    cin_max = max(cins)
    w_max = max(widths)
    c_max = max(max(couts), num_heads)

    wslab = jnp.zeros((n_layers, cin_max, w_max), jnp.bfloat16)
    pslab = jnp.zeros((n_layers, 4, c_max), jnp.float32)
    for li, p in enumerate(params):
        cin, cout = cins[li], couts[li]
        wproj = jnp.concatenate([p["wlin"], p["wu"]], axis=1)        # [cin, H*cout + H]
        wslab = wslab.at[li, :cin, :wproj.shape[1]].set(wproj.astype(jnp.bfloat16))
        pslab = pslab.at[li, 0, :num_heads].set(p["c"])
        pslab = pslab.at[li, 1, :cout].set(p["bias"][0])
        if p["bn"] is not None:
            pslab = pslab.at[li, 2, :cout].set(p["bn"][0][0])
            pslab = pslab.at[li, 3, :cout].set(p["bn"][1][0])
    return wslab, pslab, cins, couts


def edges_to_norm_adj(edge_index, num_nodes):
    """edge_index [2, E] (row 0 = source j, row 1 = target i) -> (adj[i,j] + I) / deg[i]."""
    src, dst = edge_index[0], edge_index[1]
    not_self = (src != dst).astype(jnp.float32)                        # remove_self_loops
    adj = jnp.zeros((num_nodes, num_nodes), jnp.float32)
    adj = adj.at[dst, src].max(not_self)
    adj = jnp.maximum(adj, jnp.eye(num_nodes, dtype=jnp.float32))      # add_self_loops
    deg = jnp.sum(adj, axis=1, keepdims=True)                          # >= 1 (self-loop)
    return adj / deg


def graph_feature_encoder(x, edge_index, params, num_heads):
    num_nodes = x.shape[0]
    # Layer-invariant, degree-normalized adjacency (f32; bf16 only at MXU operands).
    nadj = edges_to_norm_adj(edge_index, num_nodes)

    wslab, pslab, cins, couts = pack_params(params, num_heads)
    bn_flags = [p["bn"] is not None for p in params]

    vmem = pl.BlockSpec(memory_space=pltpu.MemorySpace.VMEM)
    kernel = _make_fused_kernel(cins, couts, num_heads, bn_flags)
    return pl.pallas_call(
        kernel,
        out_shape=jax.ShapeDtypeStruct((num_nodes, couts[-1]), jnp.float32),
        in_specs=[vmem, vmem, vmem, vmem],
        out_specs=vmem,
    )(x, nadj, wslab, pslab)


# ----------------------------------------------------------------------------
if __name__ == "__main__":
    key = jax.random.PRNGKey(0)
    N = 16                      # nodes
    in_features = 8
    conv_channels = [16, 16, 8]
    num_heads = 4

    k_x, k_p = jax.random.split(key, 2)
    x = jax.random.normal(k_x, (N, in_features), jnp.float32)

    # Undirected ring graph, no duplicates, no self loops.
    src = jnp.arange(N, dtype=jnp.int32)
    dst = (src + 1) % N
    edge_index = jnp.stack(
        [jnp.concatenate([src, dst]), jnp.concatenate([dst, src])], axis=0
    )  # [2, 2N]

    params = init_params(k_p, in_features, conv_channels, num_heads, apply_batch_norm=True)

    out = graph_feature_encoder(x, edge_index, params, num_heads)
    jax.block_until_ready(out)
    assert out.shape == (N, conv_channels[-1])
    assert bool(jnp.all(jnp.isfinite(out)))
    print("KERNEL_OK")
</pallas_src>

<mosaic_0001>
module attributes {stable_mosaic.version = 11 : i64} {
  func.func @kernel(%arg0: memref<16x8xf32, #tpu.memory_space<vmem>>, %arg1: memref<16x16xf32, #tpu.memory_space<vmem>>, %arg2: memref<3x16x68xbf16, #tpu.memory_space<vmem>>, %arg3: memref<3x4x16xf32, #tpu.memory_space<vmem>>, %arg4: memref<16x8xf32, #tpu.memory_space<vmem>>) attributes {dimension_semantics = [], scalar_prefetch = 0 : i64, scratch_operands = 0 : i64, tpu.core_type = #tpu.core_type<tc>} {
    %c0 = arith.constant 0 : index
    %c0_0 = arith.constant 0 : index
    %0 = vector.load %arg1[%c0, %c0_0] : memref<16x16xf32, #tpu.memory_space<vmem>>, vector<16x16xf32>
    %1 = vector.shape_cast %0 : vector<16x16xf32> to vector<1x16x16xf32>
    %c0_1 = arith.constant 0 : index
    %c0_2 = arith.constant 0 : index
    %2 = vector.load %arg0[%c0_1, %c0_2] : memref<16x8xf32, #tpu.memory_space<vmem>>, vector<16x8xf32>
    %c0_3 = arith.constant 0 : index
    %c0_4 = arith.constant 0 : index
    %c0_5 = arith.constant 0 : index
    %3 = vector.load %arg2[%c0_3, %c0_4, %c0_5] : memref<3x16x68xbf16, #tpu.memory_space<vmem>>, vector<1x16x68xbf16>
    %4 = vector.shape_cast %3 : vector<1x16x68xbf16> to vector<16x68xbf16>
    %5 = vector.extract_strided_slice %4 {offsets = [0, 0], sizes = [8, 68], strides = [1, 1]} : vector<16x68xbf16> to vector<8x68xbf16>
    %c0_6 = arith.constant 0 : index
    %c0_7 = arith.constant 0 : index
    %c0_8 = arith.constant 0 : index
    %6 = vector.load %arg3[%c0_6, %c0_7, %c0_8] : memref<3x4x16xf32, #tpu.memory_space<vmem>>, vector<1x4x16xf32>
    %7 = vector.shape_cast %6 : vector<1x4x16xf32> to vector<4x16xf32>
    %8 = vector.extract_strided_slice %7 {offsets = [0, 0], sizes = [1, 4], strides = [1, 1]} : vector<4x16xf32> to vector<1x4xf32>
    %9 = vector.extract_strided_slice %7 {offsets = [1, 0], sizes = [1, 16], strides = [1, 1]} : vector<4x16xf32> to vector<1x16xf32>
    %10 = arith.truncf %2 : vector<16x8xf32> to vector<16x8xbf16>
    %cst = arith.constant dense<0.000000e+00> : vector<16x68xf32>
    %11 = tpu.matmul %10, %5, %cst {dimension_numbers = #tpu.dot_dimension_numbers<[1], [0], [0], [1], [0, 0, 1, 1], [], []>} : vector<16x8xbf16>, vector<8x68xbf16>, vector<16x68xf32> -> vector<16x68xf32>
    %12 = vector.extract_strided_slice %11 {offsets = [0, 64], sizes = [16, 4], strides = [1, 1]} : vector<16x68xf32> to vector<16x4xf32>
    %13 = vector.broadcast %8 : vector<1x4xf32> to vector<16x4xf32>
    %14 = arith.addf %12, %13 : vector<16x4xf32>
    %15 = tpu.transpose %12, [1, 0] : vector<16x4xf32> -> vector<4x16xf32>
    %16 = tpu.transpose %14, [1, 0] : vector<16x4xf32> -> vector<4x16xf32>
    %17 = vector.shape_cast %16 : vector<4x16xf32> to vector<4x16x1xf32>
    %18 = vector.shape_cast %15 : vector<4x16xf32> to vector<4x1x16xf32>
    %19 = vector.broadcast %17 : vector<4x16x1xf32> to vector<4x16x16xf32>
    %20 = vector.broadcast %18 : vector<4x1x16xf32> to vector<4x16x16xf32>
    %21 = arith.subf %19, %20 : vector<4x16x16xf32>
    %cst_9 = arith.constant dense<0xFF800000> : vector<16x16xf32>
    %22 = vector.multi_reduction <maximumf>, %21, %cst_9 [0] : vector<4x16x16xf32> to vector<16x16xf32>
    %23 = vector.shape_cast %22 : vector<16x16xf32> to vector<1x16x16xf32>
    %24 = vector.broadcast %23 : vector<1x16x16xf32> to vector<4x16x16xf32>
    %25 = arith.subf %21, %24 : vector<4x16x16xf32>
    %26 = math.exp %25 : vector<4x16x16xf32>
    %cst_10 = arith.constant dense<0.000000e+00> : vector<16x16xf32>
    %27 = vector.multi_reduction <add>, %26, %cst_10 [0] : vector<4x16x16xf32> to vector<16x16xf32>
    %28 = vector.shape_cast %27 : vector<16x16xf32> to vector<1x16x16xf32>
    %29 = tpu.reciprocal %28 {approx = true} : vector<1x16x16xf32> -> vector<1x16x16xf32>
    %30 = arith.mulf %29, %1 : vector<1x16x16xf32>
    %31 = vector.broadcast %30 : vector<1x16x16xf32> to vector<4x16x16xf32>
    %32 = arith.mulf %26, %31 : vector<4x16x16xf32>
    %33 = arith.truncf %32 : vector<4x16x16xf32> to vector<4x16x16xbf16>
    %34 = vector.extract_strided_slice %11 {offsets = [0, 0], sizes = [16, 16], strides = [1, 1]} : vector<16x68xf32> to vector<16x16xf32>
    %35 = arith.truncf %34 : vector<16x16xf32> to vector<16x16xbf16>
    %36 = vector.extract_strided_slice %33 {offsets = [0, 0, 0], sizes = [1, 16, 16], strides = [1, 1, 1]} : vector<4x16x16xbf16> to vector<1x16x16xbf16>
    %37 = vector.shape_cast %36 : vector<1x16x16xbf16> to vector<16x16xbf16>
    %cst_11 = arith.constant dense<0.000000e+00> : vector<16x16xf32>
    %38 = tpu.matmul %37, %35, %cst_11 {dimension_numbers = #tpu.dot_dimension_numbers<[1], [0], [0], [1], [0, 0, 1, 1], [], []>} : vector<16x16xbf16>, vector<16x16xbf16>, vector<16x16xf32> -> vector<16x16xf32>
    %39 = vector.extract_strided_slice %11 {offsets = [0, 16], sizes = [16, 16], strides = [1, 1]} : vector<16x68xf32> to vector<16x16xf32>
    %40 = arith.truncf %39 : vector<16x16xf32> to vector<16x16xbf16>
    %41 = vector.extract_strided_slice %33 {offsets = [1, 0, 0], sizes = [1, 16, 16], strides = [1, 1, 1]} : vector<4x16x16xbf16> to vector<1x16x16xbf16>
    %42 = vector.shape_cast %41 : vector<1x16x16xbf16> to vector<16x16xbf16>
    %cst_12 = arith.constant dense<0.000000e+00> : vector<16x16xf32>
    %43 = tpu.matmul %42, %40, %cst_12 {dimension_numbers = #tpu.dot_dimension_numbers<[1], [0], [0], [1], [0, 0, 1, 1], [], []>} : vector<16x16xbf16>, vector<16x16xbf16>, vector<16x16xf32> -> vector<16x16xf32>
    %44 = arith.addf %38, %43 : vector<16x16xf32>
    %45 = vector.extract_strided_slice %11 {offsets = [0, 32], sizes = [16, 16], strides = [1, 1]} : vector<16x68xf32> to vector<16x16xf32>
    %46 = arith.truncf %45 : vector<16x16xf32> to vector<16x16xbf16>
    %47 = vector.extract_strided_slice %33 {offsets = [2, 0, 0], sizes = [1, 16, 16], strides = [1, 1, 1]} : vector<4x16x16xbf16> to vector<1x16x16xbf16>
    %48 = vector.shape_cast %47 : vector<1x16x16xbf16> to vector<16x16xbf16>
    %cst_13 = arith.constant dense<0.000000e+00> : vector<16x16xf32>
    %49 = tpu.matmul %48, %46, %cst_13 {dimension_numbers = #tpu.dot_dimension_numbers<[1], [0], [0], [1], [0, 0, 1, 1], [], []>} : vector<16x16xbf16>, vector<16x16xbf16>, vector<16x16xf32> -> vector<16x16xf32>
    %50 = arith.addf %44, %49 : vector<16x16xf32>
    %51 = vector.extract_strided_slice %11 {offsets = [0, 48], sizes = [16, 16], strides = [1, 1]} : vector<16x68xf32> to vector<16x16xf32>
    %52 = arith.truncf %51 : vector<16x16xf32> to vector<16x16xbf16>
    %53 = vector.extract_strided_slice %33 {offsets = [3, 0, 0], sizes = [1, 16, 16], strides = [1, 1, 1]} : vector<4x16x16xbf16> to vector<1x16x16xbf16>
    %54 = vector.shape_cast %53 : vector<1x16x16xbf16> to vector<16x16xbf16>
    %cst_14 = arith.constant dense<0.000000e+00> : vector<16x16xf32>
    %55 = tpu.matmul %54, %52, %cst_14 {dimension_numbers = #tpu.dot_dimension_numbers<[1], [0], [0], [1], [0, 0, 1, 1], [], []>} : vector<16x16xbf16>, vector<16x16xbf16>, vector<16x16xf32> -> vector<16x16xf32>
    %56 = arith.addf %50, %55 : vector<16x16xf32>
    %57 = vector.broadcast %9 : vector<1x16xf32> to vector<16x16xf32>
    %58 = arith.addf %56, %57 : vector<16x16xf32>
    %cst_15 = arith.constant 0.000000e+00 : f32
    %59 = vector.broadcast %cst_15 : f32 to vector<16x16xf32>
    %60 = arith.maximumf %58, %59 : vector<16x16xf32>
    %61 = vector.extract_strided_slice %7 {offsets = [2, 0], sizes = [1, 16], strides = [1, 1]} : vector<4x16xf32> to vector<1x16xf32>
    %62 = vector.extract_strided_slice %7 {offsets = [3, 0], sizes = [1, 16], strides = [1, 1]} : vector<4x16xf32> to vector<1x16xf32>
    %cst_16 = arith.constant dense<0.000000e+00> : vector<16xf32>
    %63 = vector.multi_reduction <add>, %60, %cst_16 [0] : vector<16x16xf32> to vector<16xf32>
    %64 = vector.shape_cast %63 : vector<16xf32> to vector<1x16xf32>
    %cst_17 = arith.constant 1.600000e+01 : f32
    %65 = vector.broadcast %cst_17 : f32 to vector<1x16xf32>
    %66 = arith.divf %64, %65 : vector<1x16xf32>
    %67 = vector.broadcast %66 : vector<1x16xf32> to vector<16x16xf32>
    %68 = arith.subf %60, %67 : vector<16x16xf32>
    %69 = arith.mulf %68, %68 : vector<16x16xf32>
    %cst_18 = arith.constant dense<0.000000e+00> : vector<16xf32>
    %70 = vector.multi_reduction <add>, %69, %cst_18 [0] : vector<16x16xf32> to vector<16xf32>
    %71 = vector.shape_cast %70 : vector<16xf32> to vector<1x16xf32>
    %cst_19 = arith.constant 1.600000e+01 : f32
    %72 = vector.broadcast %cst_19 : f32 to vector<1x16xf32>
    %73 = arith.divf %71, %72 : vector<1x16xf32>
    %cst_20 = arith.constant 9.99999974E-6 : f32
    %74 = vector.broadcast %cst_20 : f32 to vector<1x16xf32>
    %75 = arith.addf %73, %74 : vector<1x16xf32>
    %76 = math.rsqrt %75 : vector<1x16xf32>
    %77 = vector.broadcast %76 : vector<1x16xf32> to vector<16x16xf32>
    %78 = arith.mulf %68, %77 : vector<16x16xf32>
    %79 = vector.broadcast %61 : vector<1x16xf32> to vector<16x16xf32>
    %80 = arith.mulf %78, %79 : vector<16x16xf32>
    %81 = vector.broadcast %62 : vector<1x16xf32> to vector<16x16xf32>
    %82 = arith.addf %80, %81 : vector<16x16xf32>
    %c1 = arith.constant 1 : index
    %c0_21 = arith.constant 0 : index
    %c0_22 = arith.constant 0 : index
    %83 = vector.load %arg2[%c1, %c0_21, %c0_22] : memref<3x16x68xbf16, #tpu.memory_space<vmem>>, vector<1x16x68xbf16>
    %84 = vector.shape_cast %83 : vector<1x16x68xbf16> to vector<16x68xbf16>
    %c1_23 = arith.constant 1 : index
    %c0_24 = arith.constant 0 : index
    %c0_25 = arith.constant 0 : index
    %85 = vector.load %arg3[%c1_23, %c0_24, %c0_25] : memref<3x4x16xf32, #tpu.memory_space<vmem>>, vector<1x4x16xf32>
    %86 = vector.shape_cast %85 : vector<1x4x16xf32> to vector<4x16xf32>
    %87 = vector.extract_strided_slice %86 {offsets = [0, 0], sizes = [1, 4], strides = [1, 1]} : vector<4x16xf32> to vector<1x4xf32>
    %88 = vector.extract_strided_slice %86 {offsets = [1, 0], sizes = [1, 16], strides = [1, 1]} : vector<4x16xf32> to vector<1x16xf32>
    %89 = arith.truncf %82 : vector<16x16xf32> to vector<16x16xbf16>
    %cst_26 = arith.constant dense<0.000000e+00> : vector<16x68xf32>
    %90 = tpu.matmul %89, %84, %cst_26 {dimension_numbers = #tpu.dot_dimension_numbers<[1], [0], [0], [1], [0, 0, 1, 1], [], []>} : vector<16x16xbf16>, vector<16x68xbf16>, vector<16x68xf32> -> vector<16x68xf32>
    %91 = vector.extract_strided_slice %90 {offsets = [0, 64], sizes = [16, 4], strides = [1, 1]} : vector<16x68xf32> to vector<16x4xf32>
    %92 = vector.broadcast %87 : vector<1x4xf32> to vector<16x4xf32>
    %93 = arith.addf %91, %92 : vector<16x4xf32>
    %94 = tpu.transpose %91, [1, 0] : vector<16x4xf32> -> vector<4x16xf32>
    %95 = tpu.transpose %93, [1, 0] : vector<16x4xf32> -> vector<4x16xf32>
    %96 = vector.shape_cast %95 : vector<4x16xf32> to vector<4x16x1xf32>
    %97 = vector.shape_cast %94 : vector<4x16xf32> to vector<4x1x16xf32>
    %98 = vector.broadcast %96 : vector<4x16x1xf32> to vector<4x16x16xf32>
    %99 = vector.broadcast %97 : vector<4x1x16xf32> to vector<4x16x16xf32>
    %100 = arith.subf %98, %99 : vector<4x16x16xf32>
    %cst_27 = arith.constant dense<0xFF800000> : vector<16x16xf32>
    %101 = vector.multi_reduction <maximumf>, %100, %cst_27 [0] : vector<4x16x16xf32> to vector<16x16xf32>
    %102 = vector.shape_cast %101 : vector<16x16xf32> to vector<1x16x16xf32>
    %103 = vector.broadcast %102 : vector<1x16x16xf32> to vector<4x16x16xf32>
    %104 = arith.subf %100, %103 : vector<4x16x16xf32>
    %105 = math.exp %104 : vector<4x16x16xf32>
    %cst_28 = arith.constant dense<0.000000e+00> : vector<16x16xf32>
    %106 = vector.multi_reduction <add>, %105, %cst_28 [0] : vector<4x16x16xf32> to vector<16x16xf32>
    %107 = vector.shape_cast %106 : vector<16x16xf32> to vector<1x16x16xf32>
    %108 = tpu.reciprocal %107 {approx = true} : vector<1x16x16xf32> -> vector<1x16x16xf32>
    %109 = arith.mulf %108, %1 : vector<1x16x16xf32>
    %110 = vector.broadcast %109 : vector<1x16x16xf32> to vector<4x16x16xf32>
    %111 = arith.mulf %105, %110 : vector<4x16x16xf32>
    %112 = arith.truncf %111 : vector<4x16x16xf32> to vector<4x16x16xbf16>
    %113 = vector.extract_strided_slice %90 {offsets = [0, 0], sizes = [16, 16], strides = [1, 1]} : vector<16x68xf32> to vector<16x16xf32>
    %114 = arith.truncf %113 : vector<16x16xf32> to vector<16x16xbf16>
    %115 = vector.extract_strided_slice %112 {offsets = [0, 0, 0], sizes = [1, 16, 16], strides = [1, 1, 1]} : vector<4x16x16xbf16> to vector<1x16x16xbf16>
    %116 = vector.shape_cast %115 : vector<1x16x16xbf16> to vector<16x16xbf16>
    %cst_29 = arith.constant dense<0.000000e+00> : vector<16x16xf32>
    %117 = tpu.matmul %116, %114, %cst_29 {dimension_numbers = #tpu.dot_dimension_numbers<[1], [0], [0], [1], [0, 0, 1, 1], [], []>} : vector<16x16xbf16>, vector<16x16xbf16>, vector<16x16xf32> -> vector<16x16xf32>
    %118 = vector.extract_strided_slice %90 {offsets = [0, 16], sizes = [16, 16], strides = [1, 1]} : vector<16x68xf32> to vector<16x16xf32>
    %119 = arith.truncf %118 : vector<16x16xf32> to vector<16x16xbf16>
    %120 = vector.extract_strided_slice %112 {offsets = [1, 0, 0], sizes = [1, 16, 16], strides = [1, 1, 1]} : vector<4x16x16xbf16> to vector<1x16x16xbf16>
    %121 = vector.shape_cast %120 : vector<1x16x16xbf16> to vector<16x16xbf16>
    %cst_30 = arith.constant dense<0.000000e+00> : vector<16x16xf32>
    %122 = tpu.matmul %121, %119, %cst_30 {dimension_numbers = #tpu.dot_dimension_numbers<[1], [0], [0], [1], [0, 0, 1, 1], [], []>} : vector<16x16xbf16>, vector<16x16xbf16>, vector<16x16xf32> -> vector<16x16xf32>
    %123 = arith.addf %117, %122 : vector<16x16xf32>
    %124 = vector.extract_strided_slice %90 {offsets = [0, 32], sizes = [16, 16], strides = [1, 1]} : vector<16x68xf32> to vector<16x16xf32>
    %125 = arith.truncf %124 : vector<16x16xf32> to vector<16x16xbf16>
    %126 = vector.extract_strided_slice %112 {offsets = [2, 0, 0], sizes = [1, 16, 16], strides = [1, 1, 1]} : vector<4x16x16xbf16> to vector<1x16x16xbf16>
    %127 = vector.shape_cast %126 : vector<1x16x16xbf16> to vector<16x16xbf16>
    %cst_31 = arith.constant dense<0.000000e+00> : vector<16x16xf32>
    %128 = tpu.matmul %127, %125, %cst_31 {dimension_numbers = #tpu.dot_dimension_numbers<[1], [0], [0], [1], [0, 0, 1, 1], [], []>} : vector<16x16xbf16>, vector<16x16xbf16>, vector<16x16xf32> -> vector<16x16xf32>
    %129 = arith.addf %123, %128 : vector<16x16xf32>
    %130 = vector.extract_strided_slice %90 {offsets = [0, 48], sizes = [16, 16], strides = [1, 1]} : vector<16x68xf32> to vector<16x16xf32>
    %131 = arith.truncf %130 : vector<16x16xf32> to vector<16x16xbf16>
    %132 = vector.extract_strided_slice %112 {offsets = [3, 0, 0], sizes = [1, 16, 16], strides = [1, 1, 1]} : vector<4x16x16xbf16> to vector<1x16x16xbf16>
    %133 = vector.shape_cast %132 : vector<1x16x16xbf16> to vector<16x16xbf16>
    %cst_32 = arith.constant dense<0.000000e+00> : vector<16x16xf32>
    %134 = tpu.matmul %133, %131, %cst_32 {dimension_numbers = #tpu.dot_dimension_numbers<[1], [0], [0], [1], [0, 0, 1, 1], [], []>} : vector<16x16xbf16>, vector<16x16xbf16>, vector<16x16xf32> -> vector<16x16xf32>
    %135 = arith.addf %129, %134 : vector<16x16xf32>
    %136 = vector.broadcast %88 : vector<1x16xf32> to vector<16x16xf32>
    %137 = arith.addf %135, %136 : vector<16x16xf32>
    %cst_33 = arith.constant 0.000000e+00 : f32
    %138 = vector.broadcast %cst_33 : f32 to vector<16x16xf32>
    %139 = arith.maximumf %137, %138 : vector<16x16xf32>
    %140 = vector.extract_strided_slice %86 {offsets = [2, 0], sizes = [1, 16], strides = [1, 1]} : vector<4x16xf32> to vector<1x16xf32>
    %141 = vector.extract_strided_slice %86 {offsets = [3, 0], sizes = [1, 16], strides = [1, 1]} : vector<4x16xf32> to vector<1x16xf32>
    %cst_34 = arith.constant dense<0.000000e+00> : vector<16xf32>
    %142 = vector.multi_reduction <add>, %139, %cst_34 [0] : vector<16x16xf32> to vector<16xf32>
    %143 = vector.shape_cast %142 : vector<16xf32> to vector<1x16xf32>
    %cst_35 = arith.constant 1.600000e+01 : f32
    %144 = vector.broadcast %cst_35 : f32 to vector<1x16xf32>
    %145 = arith.divf %143, %144 : vector<1x16xf32>
    %146 = vector.broadcast %145 : vector<1x16xf32> to vector<16x16xf32>
    %147 = arith.subf %139, %146 : vector<16x16xf32>
    %148 = arith.mulf %147, %147 : vector<16x16xf32>
    %cst_36 = arith.constant dense<0.000000e+00> : vector<16xf32>
    %149 = vector.multi_reduction <add>, %148, %cst_36 [0] : vector<16x16xf32> to vector<16xf32>
    %150 = vector.shape_cast %149 : vector<16xf32> to vector<1x16xf32>
    %cst_37 = arith.constant 1.600000e+01 : f32
    %151 = vector.broadcast %cst_37 : f32 to vector<1x16xf32>
    %152 = arith.divf %150, %151 : vector<1x16xf32>
    %cst_38 = arith.constant 9.99999974E-6 : f32
    %153 = vector.broadcast %cst_38 : f32 to vector<1x16xf32>
    %154 = arith.addf %152, %153 : vector<1x16xf32>
    %155 = math.rsqrt %154 : vector<1x16xf32>
    %156 = vector.broadcast %155 : vector<1x16xf32> to vector<16x16xf32>
    %157 = arith.mulf %147, %156 : vector<16x16xf32>
    %158 = vector.broadcast %140 : vector<1x16xf32> to vector<16x16xf32>
    %159 = arith.mulf %157, %158 : vector<16x16xf32>
    %160 = vector.broadcast %141 : vector<1x16xf32> to vector<16x16xf32>
    %161 = arith.addf %159, %160 : vector<16x16xf32>
    %c2 = arith.constant 2 : index
    %c0_39 = arith.constant 0 : index
    %c0_40 = arith.constant 0 : index
    %162 = vector.load %arg2[%c2, %c0_39, %c0_40] : memref<3x16x68xbf16, #tpu.memory_space<vmem>>, vector<1x16x68xbf16>
    %163 = vector.shape_cast %162 : vector<1x16x68xbf16> to vector<16x68xbf16>
    %c2_41 = arith.constant 2 : index
    %c0_42 = arith.constant 0 : index
    %c0_43 = arith.constant 0 : index
    %164 = vector.load %arg3[%c2_41, %c0_42, %c0_43] : memref<3x4x16xf32, #tpu.memory_space<vmem>>, vector<1x4x16xf32>
    %165 = vector.shape_cast %164 : vector<1x4x16xf32> to vector<4x16xf32>
    %166 = vector.extract_strided_slice %165 {offsets = [0, 0], sizes = [1, 4], strides = [1, 1]} : vector<4x16xf32> to vector<1x4xf32>
    %167 = vector.extract_strided_slice %165 {offsets = [1, 0], sizes = [1, 8], strides = [1, 1]} : vector<4x16xf32> to vector<1x8xf32>
    %168 = arith.truncf %161 : vector<16x16xf32> to vector<16x16xbf16>
    %cst_44 = arith.constant dense<0.000000e+00> : vector<16x68xf32>
    %169 = tpu.matmul %168, %163, %cst_44 {dimension_numbers = #tpu.dot_dimension_numbers<[1], [0], [0], [1], [0, 0, 1, 1], [], []>} : vector<16x16xbf16>, vector<16x68xbf16>, vector<16x68xf32> -> vector<16x68xf32>
    %170 = vector.extract_strided_slice %169 {offsets = [0, 32], sizes = [16, 4], strides = [1, 1]} : vector<16x68xf32> to vector<16x4xf32>
    %171 = vector.broadcast %166 : vector<1x4xf32> to vector<16x4xf32>
    %172 = arith.addf %170, %171 : vector<16x4xf32>
    %173 = tpu.transpose %170, [1, 0] : vector<16x4xf32> -> vector<4x16xf32>
    %174 = tpu.transpose %172, [1, 0] : vector<16x4xf32> -> vector<4x16xf32>
    %175 = vector.shape_cast %174 : vector<4x16xf32> to vector<4x16x1xf32>
    %176 = vector.shape_cast %173 : vector<4x16xf32> to vector<4x1x16xf32>
    %177 = vector.broadcast %175 : vector<4x16x1xf32> to vector<4x16x16xf32>
    %178 = vector.broadcast %176 : vector<4x1x16xf32> to vector<4x16x16xf32>
    %179 = arith.subf %177, %178 : vector<4x16x16xf32>
    %cst_45 = arith.constant dense<0xFF800000> : vector<16x16xf32>
    %180 = vector.multi_reduction <maximumf>, %179, %cst_45 [0] : vector<4x16x16xf32> to vector<16x16xf32>
    %181 = vector.shape_cast %180 : vector<16x16xf32> to vector<1x16x16xf32>
    %182 = vector.broadcast %181 : vector<1x16x16xf32> to vector<4x16x16xf32>
    %183 = arith.subf %179, %182 : vector<4x16x16xf32>
    %184 = math.exp %183 : vector<4x16x16xf32>
    %cst_46 = arith.constant dense<0.000000e+00> : vector<16x16xf32>
    %185 = vector.multi_reduction <add>, %184, %cst_46 [0] : vector<4x16x16xf32> to vector<16x16xf32>
    %186 = vector.shape_cast %185 : vector<16x16xf32> to vector<1x16x16xf32>
    %187 = tpu.reciprocal %186 {approx = true} : vector<1x16x16xf32> -> vector<1x16x16xf32>
    %188 = arith.mulf %187, %1 : vector<1x16x16xf32>
    %189 = vector.broadcast %188 : vector<1x16x16xf32> to vector<4x16x16xf32>
    %190 = arith.mulf %184, %189 : vector<4x16x16xf32>
    %191 = arith.truncf %190 : vector<4x16x16xf32> to vector<4x16x16xbf16>
    %192 = vector.extract_strided_slice %169 {offsets = [0, 0], sizes = [16, 8], strides = [1, 1]} : vector<16x68xf32> to vector<16x8xf32>
    %193 = arith.truncf %192 : vector<16x8xf32> to vector<16x8xbf16>
    %194 = vector.extract_strided_slice %191 {offsets = [0, 0, 0], sizes = [1, 16, 16], strides = [1, 1, 1]} : vector<4x16x16xbf16> to vector<1x16x16xbf16>
    %195 = vector.shape_cast %194 : vector<1x16x16xbf16> to vector<16x16xbf16>
    %cst_47 = arith.constant dense<0.000000e+00> : vector<16x8xf32>
    %196 = tpu.matmul %195, %193, %cst_47 {dimension_numbers = #tpu.dot_dimension_numbers<[1], [0], [0], [1], [0, 0, 1, 1], [], []>} : vector<16x16xbf16>, vector<16x8xbf16>, vector<16x8xf32> -> vector<16x8xf32>
    %197 = vector.extract_strided_slice %169 {offsets = [0, 8], sizes = [16, 8], strides = [1, 1]} : vector<16x68xf32> to vector<16x8xf32>
    %198 = arith.truncf %197 : vector<16x8xf32> to vector<16x8xbf16>
    %199 = vector.extract_strided_slice %191 {offsets = [1, 0, 0], sizes = [1, 16, 16], strides = [1, 1, 1]} : vector<4x16x16xbf16> to vector<1x16x16xbf16>
    %200 = vector.shape_cast %199 : vector<1x16x16xbf16> to vector<16x16xbf16>
    %cst_48 = arith.constant dense<0.000000e+00> : vector<16x8xf32>
    %201 = tpu.matmul %200, %198, %cst_48 {dimension_numbers = #tpu.dot_dimension_numbers<[1], [0], [0], [1], [0, 0, 1, 1], [], []>} : vector<16x16xbf16>, vector<16x8xbf16>, vector<16x8xf32> -> vector<16x8xf32>
    %202 = arith.addf %196, %201 : vector<16x8xf32>
    %203 = vector.extract_strided_slice %169 {offsets = [0, 16], sizes = [16, 8], strides = [1, 1]} : vector<16x68xf32> to vector<16x8xf32>
    %204 = arith.truncf %203 : vector<16x8xf32> to vector<16x8xbf16>
    %205 = vector.extract_strided_slice %191 {offsets = [2, 0, 0], sizes = [1, 16, 16], strides = [1, 1, 1]} : vector<4x16x16xbf16> to vector<1x16x16xbf16>
    %206 = vector.shape_cast %205 : vector<1x16x16xbf16> to vector<16x16xbf16>
    %cst_49 = arith.constant dense<0.000000e+00> : vector<16x8xf32>
    %207 = tpu.matmul %206, %204, %cst_49 {dimension_numbers = #tpu.dot_dimension_numbers<[1], [0], [0], [1], [0, 0, 1, 1], [], []>} : vector<16x16xbf16>, vector<16x8xbf16>, vector<16x8xf32> -> vector<16x8xf32>
    %208 = arith.addf %202, %207 : vector<16x8xf32>
    %209 = vector.extract_strided_slice %169 {offsets = [0, 24], sizes = [16, 8], strides = [1, 1]} : vector<16x68xf32> to vector<16x8xf32>
    %210 = arith.truncf %209 : vector<16x8xf32> to vector<16x8xbf16>
    %211 = vector.extract_strided_slice %191 {offsets = [3, 0, 0], sizes = [1, 16, 16], strides = [1, 1, 1]} : vector<4x16x16xbf16> to vector<1x16x16xbf16>
    %212 = vector.shape_cast %211 : vector<1x16x16xbf16> to vector<16x16xbf16>
    %cst_50 = arith.constant dense<0.000000e+00> : vector<16x8xf32>
    %213 = tpu.matmul %212, %210, %cst_50 {dimension_numbers = #tpu.dot_dimension_numbers<[1], [0], [0], [1], [0, 0, 1, 1], [], []>} : vector<16x16xbf16>, vector<16x8xbf16>, vector<16x8xf32> -> vector<16x8xf32>
    %214 = arith.addf %208, %213 : vector<16x8xf32>
    %215 = vector.broadcast %167 : vector<1x8xf32> to vector<16x8xf32>
    %216 = arith.addf %214, %215 : vector<16x8xf32>
    %c0_51 = arith.constant 0 : index
    %c0_52 = arith.constant 0 : index
    %217 = vector.load %arg4[%c0_51, %c0_52] : memref<16x8xf32, #tpu.memory_space<vmem>>, vector<16x8xf32>
    tpu.vector_store %arg4[%c0_51, %c0_52], %216 {strides = array<i32>} : memref<16x8xf32, #tpu.memory_space<vmem>>, vector<16x8xf32>,
    return
  }
}

</mosaic_0001>

<bundles_post_ra>
// kernel: tpu_custom_call.1
= control target key start
LH: loop header
LB: loop body
LE: loop exit
PB: predicated region body
PF: predicated region fallthrough
CT: control target
= control target key end

     0   :  { %9 = vsyncpa [#allocation3], 0  ;;  %s2246_s0 = inlined_call_operand.vmem [shape: f32[16,8], index: 0, kind: input, shape index: {}]   ;;  %s2247_s1 = inlined_call_operand.hbm [shape: f32[16,16], index: 1, kind: input, shape index: {}]   ;;  %s2248_s2 = inlined_call_operand.vmem [shape: bf16[3,16,68], index: 2, kind: input, shape index: {}]   ;;  %s2249_s3 = inlined_call_operand.hbm [shape: f32[3,4,16], index: 3, kind: input, shape index: {}]   ;;  %s2250_s4 = inlined_call_operand.vmem [shape: f32[16,8], index: 4, kind: output, shape index: {}]  }
   0x1   :  { %10 = vsyncpa [#allocation5], 0  ;;  %s1934_s15 = smov [#allocation2]   ;;  %s1886_s19 = scalar_lea.hbm %s2247_s1, 256 }
   0x2   :  { %s18_s16 = sshll.u32 %s1934_s15, 4  ;;  %p1887_p0 = scmp.ne.s32.totalorder %s2247_s1, %s1886_s19  ;;  %s19_s16 = int_to_ptr.vmem [resolvable:$true] %s18_s16 }
   0x3   :  { %p1890_p1 = scmp.lt.u32.totalorder %s1886_s19, %s2247_s1 }
   0x5   :  { %p1892_p2 = pnand %p1890_p1, %p1887_p0 }
   0x7   :  { %1895 = shalt.err (!%p1892_p2)
}
   0x8   :  { %s1896_s24 = scalar_lea.vmem %s19_s16, 256  ;;  %p1901_p4 = scmp.lt.s32.totalorder %s19_s16, %s19_s16 }
   0x9   :  { %p1897_p3 = scmp.ne.s32.totalorder %s19_s16, %s1896_s24  ;;  %p1902_p5 = scmp.lt.s32.totalorder %s1896_s24, %s1896_s24 }
   0xb   :  { %p1903_p6 = por %p1902_p5, %p1901_p4 }
   0xd   :  { %p1904_p7 = pnand %p1903_p6, %p1897_p3 }
   0xf   :  { %1907 = shalt.err (!%p1904_p7)
}
  0x10   :  { %s1935_s25 = smov 128   ;;  %s1936_s26 = smov 8  }
  0x11   :  { %24 = dma.hbm_to_vmem [thread:$0]  %s2247_s1, 256, %s19_s16, [#allocation3], %s1935_s25, %s1935_s25, %s1936_s26  }
  0x12   :  { %s1937_s29 = smov [#allocation4]   ;;  %s1908_s7 = scalar_lea.hbm %s2249_s3, 192 }
  0x13   :  { %s32_s30 = sshll.u32 %s1937_s29, 4  ;;  %p1909_p8 = scmp.ne.s32.totalorder %s2249_s3, %s1908_s7  ;;  %s33_s30 = int_to_ptr.vmem [resolvable:$true] %s32_s30 }
  0x14   :  { %p1912_p9 = scmp.lt.u32.totalorder %s1908_s7, %s2249_s3 }
  0x16   :  { %p1914_p10 = pnand %p1912_p9, %p1909_p8 }
  0x18   :  { %1917 = shalt.err (!%p1914_p10)
}
  0x19   :  { %s1918_s12 = scalar_lea.vmem %s33_s30, 192  ;;  %p1923_p12 = scmp.lt.s32.totalorder %s33_s30, %s33_s30 }
  0x1a   :  { %p1919_p11 = scmp.ne.s32.totalorder %s33_s30, %s1918_s12  ;;  %p1924_p13 = scmp.lt.s32.totalorder %s1918_s12, %s1918_s12 }
  0x1c   :  { %p1925_p0 = por %p1924_p13, %p1923_p12 }
  0x1e   :  { %p1926_p1 = pnand %p1925_p0, %p1919_p11 }
  0x20   :  { %1929 = shalt.err (!%p1926_p1)
}
  0x21   :  { %s1938_s1 = smov 64   ;;  %s1939_s13 = smov 4  }
  0x22   :  { %38 = dma.hbm_to_vmem [thread:$0]  %s2249_s3, 192, %s33_s30, [#allocation5], %s1938_s1, %s1938_s1, %s1939_s13  }
  0x23   :  { %1930 = dma.done.wait [#allocation3], 256  }
  0x24   :  { %1931 = vsyncadd [#allocation3], 4294967040 }
  0x25   :  { %1932 = dma.done.wait [#allocation5], 192  }
  0x26   :  { %1933 = vsyncadd [#allocation5], 4294967104  ;;  %v1940_v0 = vmov 0.0   ;;  %vm1941_vm0 = vmmov 0   ;;  %v102_v1 = vlaneseq  ;;  %vm57_vm1 = vcmask 1043456   ;;  %v48_v5 = vld [vmem:[%s2246_s0] sm:$0xff] }
  0x27   :  { %1715 = vmatprep.subr.bf16.mxu0 %v1940_v0  ;;  %1717 = vmatprep.mubr.msk.bf16.mxu0 %vm1941_vm0, %v1940_v0  ;;  %v50_v4 = vld [vmem:[%s2248_s2] sm:$0xf]  ;;  %v49_v6 = vld [vmem:[%s2246_s0 + $0x8] sm:$0xff]  ;;  %vm53_vm2 = vcmask 64512   ;;  %s1942_s0 = smov 112   ;;  %s1943_s21 = smov 80  }
  0x28   :  { %1721 = vmatprep.subr.bf16.mxu1 %v1940_v0  ;;  %1723 = vmatprep.mubr.msk.bf16.mxu1 %vm1941_vm0, %v1940_v0  ;;  %v2006_v2 = vshrl.u32 %v102_v1, 7  ;;  %v59_v7 = vsel %vm57_vm1, %v50_v4, 0  ;;  %v52_v8 = vpack.c.bf16 %v49_v6, %v48_v5  ;;  %v2020_v9 = vld [vmem:[#allocation4] sm:$0xf]  ;;  %s1944_s22 = smov 96   ;;  %vm289_vm3 = vcmask 130048  }
  0x29   :  { %1716 = vmatpush3.bf16.msra.mxu0 %v59_v7  ;;  %v1945_v38 = vmov 1966171168   ;;  %s1946_s27 = smov 32   ;;  %s1948_s28 = smov 104  }
  0x2a   :  { %v2009_v3 = vsub.s32 0, %v2006_v2  ;;  %1727 = vmatprep.subr.bf16.mxu0 %v1940_v0  ;;  %v2038_v24 = vsub.s32 1, %v2006_v2  ;;  %v2042_v26 = vsub.s32 2, %v2006_v2  ;;  %v2046_v29 = vsub.s32 3, %v2006_v2 }
  0x2b   :  { %v238_v39 = vunpack.c.l.s4 %v1945_v38 }
  0x2c   :  { %v105_v10 = vrot.slane %v2020_v9, %v2009_v3  ;;  %1718 = vmatmul.mubr.msk.bf16.vlgmr.msra.gmra.mrb[0].mxu0 %vm53_vm2, %v52_v8 }
  0x2d   :  { %1729 = vmatprep.mubr.msk.bf16.mxu0 %vm1941_vm0, %v1940_v0  ;;  %v239_v41 = vunpack.c.0.s8 %v238_v39 }
  0x2e   :  { %107 = vrot.lane.b32.xlu0 %v105_v10, %s1938_s1 }
  0x2f   :  { %v2052_v43 = vsub.s32 %v239_v41, %v2006_v2 }
  0xa0   :  { %v108_v11 = vpop.permute.xlu0 %107 }
  0xff   :  { %v95_v12 = vpop.f32.mrb[0].mxu0 }
 0x100   :  { %v1719_v13 = vpop.f32.mrb[1].mxu0  ;;  %v110_v14 = vadd.f32 %v108_v11, %v95_v12 }
 0x101   :  { %v98_v15 = vpop.f32.mrb[2].mxu0 }
 0x102   :  { %v358_v16 = vpack.c.bf16 %v98_v15, %v95_v12  ;;  %154 = vrot.lane.b32.xlu0 %v110_v14, %s1938_s1  ;;  %v1720_v17 = vpop.f32.mrb[3].mxu0  ;;  %v111_v18 = vadd.f32 %v108_v11, %v98_v15 }
 0x104   :  { %1728 = vmatpush3.bf16.msra.mxu0 %v358_v16  ;;  %156 = vrot.lane.b32.xlu1 %v111_v18, %s1938_s1 }
 0x105   :  { %1739 = vmatprep.subr.bf16.mxu0 %v1940_v0 }
 0x106   :  { %116 = vrot.lane.b32.xlu0 %v98_v15, %s1938_s1 }
 0x108   :  { %114 = vrot.lane.b32.xlu1 %v95_v12, %s1938_s1 }
 0x174   :  { %v155_v19 = vpop.permute.xlu0 %154 }
 0x175   :  { %160 = vxpose.xlu1.b32.start [1/2] (short) (narrow) %v155_v19, 8 }
 0x176   :  { %v157_v20 = vpop.permute.xlu1 %156 }
 0x178   :  { %v117_v31 = vpop.permute.xlu0 %116 }
 0x179   :  { %161 = vxpose.xlu1.b32.end [2/2] (short) (narrow) %v157_v20, 8 }
 0x17a   :  { %v115_v21 = vpop.permute.xlu1 %114 }
 0x197   :  { %360 = vrot.lane.b32.xlu1 %v358_v16, %s1942_s0 }
 0x19b   :  { %500 = vrot.lane.b32.xlu1 %v358_v16, %s1943_s21 }
 0x1f5   :  { %v176_v22 = vpop.trf.xlu1 }
 0x1f6   :  { %v195_v23 = vrot.slane %v176_v22, %v2009_v3  ;;  %v206_v25 = vrot.slane %v176_v22, %v2038_v24  ;;  %v217_v27 = vrot.slane %v176_v22, %v2042_v26  ;;  %v228_v30 = vrot.slane %v176_v22, %v2046_v29 }
 0x1f8   :  { %197 = vbcast.lane.b32.xlu0 %v195_v23, 256 }
 0x1fc   :  { %201 = vbcast.lane.b32.xlu0 %v195_v23, 264 }
 0x200   :  { %208 = vbcast.lane.b32.xlu0 %v206_v25, 256 }
 0x204   :  { %212 = vbcast.lane.b32.xlu0 %v206_v25, 264 }
 0x208   :  { %219 = vbcast.lane.b32.xlu0 %v217_v27, 256 }
 0x209   :  { %v361_v28 = vpop.permute.xlu1 %360 }
 0x20a   :  { %1722 = vmatpush3.bf16.msra.mxu1 %v361_v28 }
 0x20b   :  { %1733 = vmatprep.subr.bf16.mxu1 %v1940_v0 }
 0x20c   :  { %223 = vbcast.lane.b32.xlu0 %v217_v27, 264 }
 0x210   :  { %230 = vbcast.lane.b32.xlu0 %v228_v30, 256 }
 0x214   :  { %234 = vbcast.lane.b32.xlu0 %v228_v30, 264 }
 0x232   :  { %120 = vxpose.xlu0.b32.start [1/2] (short) (narrow) %v115_v21, 8 }
 0x236   :  { %121 = vxpose.xlu0.b32.end [2/2] (short) (narrow) %v117_v31, 8 }
 0x25f   :  { %451 = vrot.lane.b32.xlu0 %v358_v16, %s1944_s22 }
 0x26a   :  { %v198_v32 = vpop.permute.xlu0 %197 }
 0x26e   :  { %v202_v33 = vpop.permute.xlu0 %201 }
 0x272   :  { %v209_v34 = vpop.permute.xlu0 %208 }
 0x276   :  { %v213_v35 = vpop.permute.xlu0 %212 }
 0x27a   :  { %v220_v36 = vpop.permute.xlu0 %219 }
 0x27e   :  { %v224_v37 = vpop.permute.xlu0 %223 }
 0x282   :  { %v231_v40 = vpop.permute.xlu0 %230 }
 0x286   :  { %v235_v42 = vpop.permute.xlu0 %234 }
 0x2b2   :  { %v136_v44 = vpop.trf.xlu0 }
 0x2b3   :  { %v243_v45 = vrot.slane %v136_v44, %v2052_v43 }
 0x2b5   :  { %v244_v46 = vcombine.high %v243_v45, %v243_v45  ;;  %v251_v47 = vrot.slane %v243_v45, %v2052_v43 }
 0x2b7   :  { %v258_v48 = vrot.slane %v244_v46, %v2052_v43  ;;  %v259_v49 = vcombine.high %v251_v47, %v251_v47  ;;  %v264_v50 = vrot.slane %v251_v47, %v2009_v3 }
 0x2b9   :  { %v260_v51 = vcombine.high %v258_v48, %v258_v48  ;;  %v268_v52 = vrot.slane %v258_v48, %v2009_v3  ;;  %v272_v53 = vrot.slane %v259_v49, %v2009_v3  ;;  %v281_v54 = vsub.f32 %v198_v32, %v264_v50 }
 0x2ba   :  { %v282_v55 = vsub.f32 %v202_v33, %v264_v50 }
 0x2bb   :  { %v276_v56 = vrot.slane %v260_v51, %v2009_v3  ;;  %v283_v57 = vsub.f32 %v209_v34, %v268_v52  ;;  %v284_v58 = vsub.f32 %v213_v35, %v268_v52  ;;  %v285_v59 = vsub.f32 %v220_v36, %v272_v53 }
 0x2bc   :  { %v286_v60 = vsub.f32 %v224_v37, %v272_v53  ;;  %v290_v1 = vsel %vm289_vm3, %v281_v54, -inf  ;;  %v297_v2 = vsel %vm289_vm3, %v282_v55, -inf }
 0x2bd   :  { %v287_v61 = vsub.f32 %v231_v40, %v276_v56  ;;  %v288_v62 = vsub.f32 %v235_v42, %v276_v56  ;;  %v292_v63 = vsel %vm289_vm3, %v285_v59, -inf  ;;  %v291_v5 = vsel %vm289_vm3, %v283_v57, -inf }
 0x2be   :  { %v299_v4 = vsel %vm289_vm3, %v286_v60, -inf  ;;  %v298_v7 = vsel %vm289_vm3, %v284_v58, -inf  ;;  %v293_v10 = vmax.f32 %v290_v1, %v292_v63 }
 0x2bf   :  { %v294_v6 = vsel %vm289_vm3, %v287_v61, -inf  ;;  %v301_v8 = vsel %vm289_vm3, %v288_v62, -inf  ;;  %v300_v12 = vmax.f32 %v297_v2, %v299_v4 }
 0x2c0   :  { %v295_v11 = vmax.f32 %v291_v5, %v294_v6  ;;  %v302_v13 = vmax.f32 %v298_v7, %v301_v8  ;;  %v501_v8 = vpop.permute.xlu1 %500 }
 0x2c2   :  { %v296_v14 = vmax.f32 %v293_v10, %v295_v11  ;;  %v303_v15 = vmax.f32 %v300_v12, %v302_v13 }
 0x2c4   :  { %v304_v16 = vsub.f32 %v281_v54, %v296_v14  ;;  %v305_v17 = vsub.f32 %v282_v55, %v303_v15  ;;  %v306_v18 = vsub.f32 %v283_v57, %v296_v14  ;;  %v307_v19 = vsub.f32 %v284_v58, %v303_v15  ;;  %v2077_v58 = vld [vmem:[#allocation2] sm:$0xff] }
 0x2c5   :  { %v308_v20 = vsub.f32 %v285_v59, %v296_v14  ;;  %v309_v21 = vsub.f32 %v286_v60, %v303_v15  ;;  %v310_v22 = vsub.f32 %v287_v61, %v296_v14  ;;  %v311_v28 = vsub.f32 %v288_v62, %v303_v15  ;;  %v2079_v59 = vld [vmem:[#allocation2 + $0x8] sm:$0xff] }
 0x2c6   :  { %v312_v23 = vmul.f32 1.442695, %v304_v16  ;;  %v314_v25 = vmul.f32 1.442695, %v305_v17  ;;  %v316_v27 = vmul.f32 1.442695, %v306_v18 }
 0x2c7   :  { %v318_v30 = vmul.f32 1.442695, %v307_v19  ;;  %v320_v31 = vmul.f32 1.442695, %v308_v20  ;;  %v322_v32 = vmul.f32 1.442695, %v309_v21 }
 0x2c8   :  { %1822 = vpow2.f32 %v312_v23  ;;  %v324_v33 = vmul.f32 1.442695, %v310_v22  ;;  %v326_v34 = vmul.f32 1.442695, %v311_v28  ;;  %v1820_v17 = vld [vmem:[%s2248_s2 + $0x8] sm:$0xff]  }
 0x2c9   :  { %1824 = vpow2.f32 %v314_v25  ;;  %v2101_v18 = vld [vmem:[#allocation4 + $0x4] sm:$0xf] }
 0x2ca   :  { %1826 = vpow2.f32 %v316_v27  ;;  %v657_v19 = vrot.slane %v2101_v18, %v2009_v3 }
 0x2cb   :  { %1828 = vpow2.f32 %v318_v30 }
 0x2cc   :  { %1830 = vpow2.f32 %v320_v31  ;;  %659 = vrot.lane.b32.xlu1 %v657_v19, %s1938_s1 }
 0x2cd   :  { %1832 = vpow2.f32 %v322_v32 }
 0x2ce   :  { %1834 = vpow2.f32 %v324_v33 }
 0x2cf   :  { %1836 = vpow2.f32 %v326_v34 }
 0x2d1   :  { %v452_v10 = vpop.permute.xlu0 %451 }
 0x2d2   :  { %v1823_v35 = vpop.eup %1822 }
 0x2d3   :  { %v1825_v36 = vpop.eup %1824  ;;  %v328_v37 = vsel %vm289_vm3, %v1823_v35, 0.0 }
 0x2d4   :  { %v1827_v38 = vpop.eup %1826  ;;  %v335_v39 = vsel %vm289_vm3, %v1825_v36, 0.0 }
 0x2d5   :  { %v1829_v40 = vpop.eup %1828  ;;  %v329_v41 = vsel %vm289_vm3, %v1827_v38, 0.0 }
 0x2d6   :  { %v1831_v42 = vpop.eup %1830  ;;  %v330_v44 = vadd.f32 %v329_v41, %v328_v37  ;;  %v336_v45 = vsel %vm289_vm3, %v1829_v40, 0.0 }
 0x2d7   :  { %v1833_v46 = vpop.eup %1832  ;;  %v331_v47 = vsel %vm289_vm3, %v1831_v42, 0.0  ;;  %v337_v48 = vadd.f32 %v336_v45, %v335_v39 }
 0x2d8   :  { %v1835_v49 = vpop.eup %1834  ;;  %v332_v50 = vadd.f32 %v331_v47, %v330_v44  ;;  %v338_v51 = vsel %vm289_vm3, %v1833_v46, 0.0 }
 0x2d9   :  { %v1837_v52 = vpop.eup %1836  ;;  %v333_v53 = vsel %vm289_vm3, %v1835_v49, 0.0  ;;  %v339_v54 = vadd.f32 %v338_v51, %v337_v48 }
 0x2da   :  { %v334_v55 = vadd.f32 %v333_v53, %v332_v50  ;;  %v340_v56 = vsel %vm289_vm3, %v1837_v52, 0.0 }
 0x2db   :  { %v341_v57 = vadd.f32 %v340_v56, %v339_v54 }
 0x2dc   :  { %1838 = vrcp.f32 %v334_v55 }
 0x2dd   :  { %1840 = vrcp.f32 %v341_v57 }
 0x2e6   :  { %v1839_v60 = vpop.eup %1838 }
 0x2e7   :  { %v1841_v61 = vpop.eup %1840  ;;  %v344_v62 = vmul.f32 %v1839_v60, %v2077_v58 }
 0x2e8   :  { %v345_v63 = vmul.f32 %v1841_v61, %v2079_v59 }
 0x2e9   :  { %v348_v1 = vmul.f32 %v1827_v38, %v344_v62  ;;  %v346_v2 = vmul.f32 %v1823_v35, %v344_v62  ;;  %v350_v11 = vmul.f32 %v1831_v42, %v344_v62  ;;  %v352_v13 = vmul.f32 %v1835_v49, %v344_v62 }
 0x2ea   :  { %v349_v4 = vmul.f32 %v1829_v40, %v345_v63  ;;  %v347_v5 = vmul.f32 %v1825_v36, %v345_v63  ;;  %v351_v12 = vmul.f32 %v1833_v46, %v345_v63  ;;  %v353_v14 = vmul.f32 %v1837_v52, %v345_v63 }
 0x2eb   :  { %v552_v36 = vrot.slane %v2020_v9, %v2038_v24 }
 0x2ec   :  { %v355_v6 = vpack.c.bf16 %v349_v4, %v348_v1  ;;  %v354_v7 = vpack.c.bf16 %v347_v5, %v346_v2  ;;  %v356_v15 = vpack.c.bf16 %v351_v12, %v350_v11  ;;  %v357_v16 = vpack.c.bf16 %v353_v14, %v352_v13 }
 0x2ee   :  { %1724 = vmatmul.mubr.msk.bf16.vlgmr.msra.gmra.mrb[0].mxu1 %vm289_vm3, %v355_v6  ;;  %1730 = vmatmul.mubr.msk.bf16.vlgmr.msra.gmra.mrb[4].mxu0 %vm289_vm3, %v354_v7 }
 0x2ef   :  { %1734 = vmatpush3.bf16.msra.mxu1 %v452_v10  ;;  %1740 = vmatpush3.bf16.msra.mxu0 %v501_v8 }
 0x2f0   :  { %1735 = vmatprep.mubr.msk.bf16.mxu1 %vm1941_vm0, %v1940_v0  ;;  %1741 = vmatprep.mubr.msk.bf16.mxu0 %vm1941_vm0, %v1940_v0 }
 0x2f1   :  { %1745 = vmatprep.subr.bf16.mxu1 %v1940_v0  ;;  %1751 = vmatprep.subr.bf16.mxu0 %v1940_v0 }
 0x2f6   :  { %1736 = vmatmul.mubr.msk.bf16.vlgmr.msra.gmra.mrb[4].mxu1 %vm289_vm3, %v356_v15  ;;  %1742 = vmatmul.mubr.msk.bf16.vlgmr.msra.gmra.mrb[8].mxu0 %vm289_vm3, %v357_v16 }
 0x2f7   :  { %1747 = vmatprep.mubr.msk.bf16.mxu1 %vm1941_vm0, %v1940_v0  ;;  %1753 = vmatprep.mubr.msk.bf16.mxu0 %vm1941_vm0, %v1940_v0 }
 0x2f8   :  { %1746 = vmatpush3.bf16.msra.mxu1 %v1820_v17  ;;  %v589_v17 = vrot.slane %v2020_v9, %v2042_v26 }
 0x2f9   :  { %1757 = vmatprep.subr.bf16.mxu1 %v1940_v0 }
 0x3c1   :  { %v400_v20 = vpop.f32.mrb[0].mxu1  ;;  %v444_v21 = vpop.f32.mrb[4].mxu0 }
 0x3c2   :  { %v445_v22 = vadd.f32 %v444_v21, %v400_v20  ;;  %v1725_v23 = vpop.f32.mrb[1].mxu1  ;;  %v1731_v25 = vpop.f32.mrb[5].mxu0  ;;  %v595_v20 = vrot.slane %v2020_v9, %v2046_v29 }
 0x3c3   :  { %v403_v27 = vpop.f32.mrb[2].mxu1  ;;  %v447_v28 = vpop.f32.mrb[6].mxu0 }
 0x3c4   :  { %v448_v30 = vadd.f32 %v447_v28, %v403_v27  ;;  %v1726_v31 = vpop.f32.mrb[3].mxu1  ;;  %v1732_v32 = vpop.f32.mrb[7].mxu0 }
 0x3c5   :  { %v660_v31 = vpop.permute.xlu1 %659 }
 0x3c9   :  { %v491_v33 = vpop.f32.mrb[4].mxu1  ;;  %v540_v34 = vpop.f32.mrb[8].mxu0 }
 0x3ca   :  { %v498_v35 = vadd.f32 %v491_v33, %v445_v22  ;;  %v1737_v37 = vpop.f32.mrb[5].mxu1  ;;  %v1743_v38 = vpop.f32.mrb[9].mxu0 }
 0x3cb   :  { %v494_v39 = vpop.f32.mrb[6].mxu1  ;;  %v543_v40 = vpop.f32.mrb[10].mxu0 }
 0x3cc   :  { %v547_v41 = vadd.f32 %v540_v34, %v498_v35  ;;  %v499_v42 = vadd.f32 %v494_v39, %v448_v30  ;;  %v1738_v44 = vpop.f32.mrb[7].mxu1  ;;  %v1744_v45 = vpop.f32.mrb[11].mxu0 }
 0x3ce   :  { %v553_v46 = vadd.f32 %v552_v36, %v547_v41  ;;  %v548_v47 = vadd.f32 %v543_v40, %v499_v42 }
 0x3d0   :  { %v555_v48 = vmax.f32 %v553_v46, 0.0  ;;  %v554_v49 = vadd.f32 %v552_v36, %v548_v47 }
 0x3d2   :  { %v556_v50 = vmax.f32 %v554_v49, 0.0  ;;  %v557_v51 = vsel %vm289_vm3, %v555_v48, 0.0 }
 0x3d4   :  { %v558_v52 = vsel %vm289_vm3, %v556_v50, 0.0 }
 0x3d5   :  { %v559_v53 = vadd.f32 %v558_v52, %v557_v51 }
 0x3d7   :  { %v560_v54 = vrot.slane %v559_v53, 4 }
 0x3d9   :  { %v561_v55 = vadd.f32 %v560_v54, %v559_v53 }
 0x3db   :  { %v562_v56 = vrot.slane %v561_v55, 2 }
 0x3dd   :  { %v563_v57 = vadd.f32 %v562_v56, %v561_v55 }
 0x3df   :  { %v564_v60 = vrot.slane %v563_v57, 1 }
 0x3e1   :  { %v565_v61 = vadd.f32 %v564_v60, %v563_v57 }
 0x3e3   :  { %v567_v62 = vmul.f32 0.0625, %v565_v61 }
 0x3e5   :  { %v568_v63 = vsub.f32 %v555_v48, %v567_v62  ;;  %v569_v1 = vsub.f32 %v556_v50, %v567_v62 }
 0x3e7   :  { %v570_v2 = vmul.f32 %v568_v63, %v568_v63  ;;  %v571_v4 = vmul.f32 %v569_v1, %v569_v1 }
 0x3e9   :  { %v572_v5 = vsel %vm289_vm3, %v570_v2, 0.0  ;;  %v573_v6 = vsel %vm289_vm3, %v571_v4, 0.0 }
 0x3ea   :  { %v574_v7 = vadd.f32 %v573_v6, %v572_v5 }
 0x3ec   :  { %v575_v8 = vrot.slane %v574_v7, 4 }
 0x3ee   :  { %v576_v10 = vadd.f32 %v575_v8, %v574_v7 }
 0x3f0   :  { %v577_v11 = vrot.slane %v576_v10, 2 }
 0x3f2   :  { %v578_v12 = vadd.f32 %v577_v11, %v576_v10 }
 0x3f4   :  { %v579_v13 = vrot.slane %v578_v12, 1 }
 0x3f6   :  { %v580_v14 = vadd.f32 %v579_v13, %v578_v12 }
 0x3f8   :  { %v581_v15 = vmul.f32 0.0625, %v580_v14 }
 0x3fa   :  { %v582_v16 = vadd.f32 1e-05, %v581_v15 }
 0x3fc   :  { %1842 = vrsqrt.f32 %v582_v16 }
 0x406   :  { %v1843_v19 = vpop.eup %1842 }
 0x407   :  { %v584_v21 = vmul.f32 %v1843_v19, %v568_v63  ;;  %v585_v22 = vmul.f32 %v1843_v19, %v569_v1 }
 0x409   :  { %v590_v23 = vmul.f32 %v589_v17, %v584_v21  ;;  %v591_v25 = vmul.f32 %v589_v17, %v585_v22 }
 0x40b   :  { %v597_v27 = vadd.f32 %v595_v20, %v591_v25  ;;  %v596_v28 = vadd.f32 %v595_v20, %v590_v23 }
 0x40d   :  { %v603_v30 = vpack.c.bf16 %v597_v27, %v596_v28 }
 0x40f   :  { %1748 = vmatmul.mubr.msk.bf16.vlgmr.msra.gmra.mrb[8].mxu1 %vm289_vm3, %v603_v30 }
 0x410   :  { %1759 = vmatprep.mubr.msk.bf16.mxu1 %vm1941_vm0, %v1940_v0 }
 0x4e2   :  { %v647_v32 = vpop.f32.mrb[8].mxu1 }
 0x4e3   :  { %v1749_v33 = vpop.f32.mrb[9].mxu1  ;;  %v662_v34 = vadd.f32 %v660_v31, %v647_v32 }
 0x4e4   :  { %v650_v35 = vpop.f32.mrb[10].mxu1 }
 0x4e5   :  { %v909_v36 = vpack.c.bf16 %v650_v35, %v647_v32  ;;  %706 = vrot.lane.b32.xlu1 %v662_v34, %s1938_s1  ;;  %v1750_v9 = vpop.f32.mrb[11].mxu1  ;;  %v663_v37 = vadd.f32 %v660_v31, %v650_v35 }
 0x4e7   :  { %1758 = vmatpush3.bf16.msra.mxu1 %v909_v36 }
 0x4e8   :  { %1769 = vmatprep.subr.bf16.mxu1 %v1940_v0 }
 0x4e9   :  { %708 = vrot.lane.b32.xlu1 %v663_v37, %s1938_s1 }
 0x4ed   :  { %666 = vrot.lane.b32.xlu1 %v647_v32, %s1938_s1 }
 0x4f1   :  { %668 = vrot.lane.b32.xlu1 %v650_v35, %s1938_s1 }
 0x557   :  { %v707_v38 = vpop.permute.xlu1 %706 }
 0x558   :  { %712 = vxpose.xlu1.b32.start [1/2] (short) (narrow) %v707_v38, 8 }
 0x55b   :  { %v709_v39 = vpop.permute.xlu1 %708 }
 0x55c   :  { %713 = vxpose.xlu1.b32.end [2/2] (short) (narrow) %v709_v39, 8 }
 0x55f   :  { %v667_v40 = vpop.permute.xlu1 %666 }
 0x563   :  { %v669_v41 = vpop.permute.xlu1 %668 }
 0x57a   :  { %911 = vrot.lane.b32.xlu1 %v909_v36, %s1942_s0 }
 0x57e   :  { %1002 = vrot.lane.b32.xlu1 %v909_v36, %s1944_s22 }
 0x5d8   :  { %v728_v42 = vpop.trf.xlu1 }
 0x5d9   :  { %v747_v44 = vrot.slane %v728_v42, %v2009_v3  ;;  %v758_v45 = vrot.slane %v728_v42, %v2038_v24  ;;  %v769_v46 = vrot.slane %v728_v42, %v2042_v26  ;;  %v780_v48 = vrot.slane %v728_v42, %v2046_v29 }
 0x5db   :  { %749 = vbcast.lane.b32.xlu0 %v747_v44, 256 }
 0x5df   :  { %753 = vbcast.lane.b32.xlu0 %v747_v44, 264 }
 0x5e3   :  { %760 = vbcast.lane.b32.xlu0 %v758_v45, 256 }
 0x5e7   :  { %764 = vbcast.lane.b32.xlu0 %v758_v45, 264 }
 0x5eb   :  { %771 = vbcast.lane.b32.xlu0 %v769_v46, 256 }
 0x5ec   :  { %v912_v47 = vpop.permute.xlu1 %911 }
 0x5ed   :  { %1752 = vmatpush3.bf16.msra.mxu0 %v912_v47 }
 0x5ee   :  { %1763 = vmatprep.subr.bf16.mxu0 %v1940_v0 }
 0x5ef   :  { %775 = vbcast.lane.b32.xlu0 %v769_v46, 264 }
 0x5f3   :  { %782 = vbcast.lane.b32.xlu0 %v780_v48, 256 }
 0x5f7   :  { %786 = vbcast.lane.b32.xlu0 %v780_v48, 264 }
 0x615   :  { %672 = vxpose.xlu0.b32.start [1/2] (short) (narrow) %v667_v40, 8 }
 0x619   :  { %673 = vxpose.xlu0.b32.end [2/2] (short) (narrow) %v669_v41, 8 }
 0x642   :  { %1051 = vrot.lane.b32.xlu0 %v909_v36, %s1943_s21 }
 0x64d   :  { %v750_v49 = vpop.permute.xlu0 %749 }
 0x651   :  { %v754_v50 = vpop.permute.xlu0 %753 }
 0x655   :  { %v761_v51 = vpop.permute.xlu0 %760 }
 0x659   :  { %v765_v52 = vpop.permute.xlu0 %764 }
 0x65d   :  { %v772_v53 = vpop.permute.xlu0 %771 }
 0x661   :  { %v776_v54 = vpop.permute.xlu0 %775 }
 0x665   :  { %v783_v55 = vpop.permute.xlu0 %782 }
 0x669   :  { %v787_v56 = vpop.permute.xlu0 %786 }
 0x695   :  { %v688_v57 = vpop.trf.xlu0 }
 0x696   :  { %v795_v60 = vrot.slane %v688_v57, %v2052_v43 }
 0x698   :  { %v796_v61 = vcombine.high %v795_v60, %v795_v60  ;;  %v803_v62 = vrot.slane %v795_v60, %v2052_v43 }
 0x69a   :  { %v810_v63 = vrot.slane %v796_v61, %v2052_v43  ;;  %v811_v1 = vcombine.high %v803_v62, %v803_v62  ;;  %v816_v2 = vrot.slane %v803_v62, %v2009_v3 }
 0x69c   :  { %v812_v4 = vcombine.high %v810_v63, %v810_v63  ;;  %v820_v5 = vrot.slane %v810_v63, %v2009_v3  ;;  %v824_v6 = vrot.slane %v811_v1, %v2009_v3  ;;  %v833_v7 = vsub.f32 %v750_v49, %v816_v2 }
 0x69d   :  { %v834_v8 = vsub.f32 %v754_v50, %v816_v2 }
 0x69e   :  { %v828_v10 = vrot.slane %v812_v4, %v2009_v3  ;;  %v835_v11 = vsub.f32 %v761_v51, %v820_v5  ;;  %v836_v12 = vsub.f32 %v765_v52, %v820_v5  ;;  %v837_v13 = vsub.f32 %v772_v53, %v824_v6 }
 0x69f   :  { %v838_v14 = vsub.f32 %v776_v54, %v824_v6  ;;  %v841_v19 = vsel %vm289_vm3, %v833_v7, -inf  ;;  %v848_v20 = vsel %vm289_vm3, %v834_v8, -inf }
 0x6a0   :  { %v839_v15 = vsub.f32 %v783_v55, %v828_v10  ;;  %v840_v16 = vsub.f32 %v787_v56, %v828_v10  ;;  %v843_v17 = vsel %vm289_vm3, %v837_v13, -inf  ;;  %v842_v22 = vsel %vm289_vm3, %v835_v11, -inf }
 0x6a1   :  { %v850_v21 = vsel %vm289_vm3, %v838_v14, -inf  ;;  %v849_v25 = vsel %vm289_vm3, %v836_v12, -inf  ;;  %v844_v28 = vmax.f32 %v841_v19, %v843_v17 }
 0x6a2   :  { %v845_v23 = vsel %vm289_vm3, %v839_v15, -inf  ;;  %v852_v27 = vsel %vm289_vm3, %v840_v16, -inf  ;;  %v851_v31 = vmax.f32 %v848_v20, %v850_v21 }
 0x6a3   :  { %v846_v30 = vmax.f32 %v842_v22, %v845_v23  ;;  %v853_v32 = vmax.f32 %v849_v25, %v852_v27  ;;  %v1003_v27 = vpop.permute.xlu1 %1002 }
 0x6a5   :  { %v847_v33 = vmax.f32 %v844_v28, %v846_v30  ;;  %v854_v34 = vmax.f32 %v851_v31, %v853_v32 }
 0x6a7   :  { %v855_v35 = vsub.f32 %v833_v7, %v847_v33  ;;  %v856_v36 = vsub.f32 %v834_v8, %v854_v34  ;;  %v857_v9 = vsub.f32 %v835_v11, %v847_v33  ;;  %v858_v37 = vsub.f32 %v836_v12, %v854_v34 }
 0x6a8   :  { %v859_v38 = vsub.f32 %v837_v13, %v847_v33  ;;  %v860_v39 = vsub.f32 %v838_v14, %v854_v34  ;;  %v861_v40 = vsub.f32 %v839_v15, %v847_v33  ;;  %v862_v45 = vsub.f32 %v840_v16, %v854_v34 }
 0x6a9   :  { %v863_v41 = vmul.f32 1.442695, %v855_v35  ;;  %v865_v42 = vmul.f32 1.442695, %v856_v36  ;;  %v867_v44 = vmul.f32 1.442695, %v857_v9 }
 0x6aa   :  { %v869_v46 = vmul.f32 1.442695, %v858_v37  ;;  %v871_v47 = vmul.f32 1.442695, %v859_v38  ;;  %v873_v48 = vmul.f32 1.442695, %v860_v39 }
 0x6ab   :  { %1844 = vpow2.f32 %v863_v41  ;;  %v875_v49 = vmul.f32 1.442695, %v861_v40  ;;  %v877_v50 = vmul.f32 1.442695, %v862_v45  ;;  %v1821_v36 = vld [vmem:[%s2248_s2 + $0x10] sm:$0xff]   ;;  %s1947_s2 = smov 120  }
 0x6ac   :  { %1846 = vpow2.f32 %v865_v42  ;;  %v2175_v9 = vld [vmem:[#allocation4 + $0x8] sm:$0xf] }
 0x6ad   :  { %1848 = vpow2.f32 %v867_v44  ;;  %v1207_v37 = vrot.slane %v2175_v9, %v2009_v3 }
 0x6ae   :  { %1850 = vpow2.f32 %v869_v46 }
 0x6af   :  { %1852 = vpow2.f32 %v871_v47  ;;  %1209 = vrot.lane.b32.xlu1 %v1207_v37, %s1946_s27 }
 0x6b0   :  { %1854 = vpow2.f32 %v873_v48 }
 0x6b1   :  { %1856 = vpow2.f32 %v875_v49 }
 0x6b2   :  { %1858 = vpow2.f32 %v877_v50 }
 0x6b4   :  { %v1052_v28 = vpop.permute.xlu0 %1051 }
 0x6b5   :  { %v1845_v51 = vpop.eup %1844 }
 0x6b6   :  { %v1847_v52 = vpop.eup %1846  ;;  %v879_v53 = vsel %vm289_vm3, %v1845_v51, 0.0 }
 0x6b7   :  { %v1849_v54 = vpop.eup %1848  ;;  %v886_v55 = vsel %vm289_vm3, %v1847_v52, 0.0 }
 0x6b8   :  { %v1851_v56 = vpop.eup %1850  ;;  %v880_v57 = vsel %vm289_vm3, %v1849_v54, 0.0 }
 0x6b9   :  { %v1853_v60 = vpop.eup %1852  ;;  %v881_v61 = vadd.f32 %v880_v57, %v879_v53  ;;  %v887_v62 = vsel %vm289_vm3, %v1851_v56, 0.0 }
 0x6ba   :  { %v1855_v63 = vpop.eup %1854  ;;  %v882_v1 = vsel %vm289_vm3, %v1853_v60, 0.0  ;;  %v888_v2 = vadd.f32 %v887_v62, %v886_v55 }
 0x6bb   :  { %v1857_v4 = vpop.eup %1856  ;;  %v883_v5 = vadd.f32 %v882_v1, %v881_v61  ;;  %v889_v6 = vsel %vm289_vm3, %v1855_v63, 0.0 }
 0x6bc   :  { %v1859_v7 = vpop.eup %1858  ;;  %v884_v8 = vsel %vm289_vm3, %v1857_v4, 0.0  ;;  %v890_v10 = vadd.f32 %v889_v6, %v888_v2 }
 0x6bd   :  { %v885_v11 = vadd.f32 %v884_v8, %v883_v5  ;;  %v891_v12 = vsel %vm289_vm3, %v1859_v7, 0.0 }
 0x6be   :  { %v892_v13 = vadd.f32 %v891_v12, %v890_v10 }
 0x6bf   :  { %1860 = vrcp.f32 %v885_v11 }
 0x6c0   :  { %1862 = vrcp.f32 %v892_v13 }
 0x6c9   :  { %v1861_v14 = vpop.eup %1860 }
 0x6ca   :  { %v1863_v15 = vpop.eup %1862  ;;  %v895_v16 = vmul.f32 %v1861_v14, %v2077_v58 }
 0x6cb   :  { %v896_v17 = vmul.f32 %v1863_v15, %v2079_v59 }
 0x6cc   :  { %v899_v19 = vmul.f32 %v1849_v54, %v895_v16  ;;  %v897_v20 = vmul.f32 %v1845_v51, %v895_v16  ;;  %v901_v30 = vmul.f32 %v1853_v60, %v895_v16  ;;  %v903_v32 = vmul.f32 %v1857_v4, %v895_v16 }
 0x6cd   :  { %v900_v21 = vmul.f32 %v1851_v56, %v896_v17  ;;  %v898_v22 = vmul.f32 %v1847_v52, %v896_v17  ;;  %v902_v31 = vmul.f32 %v1855_v63, %v896_v17  ;;  %v904_v33 = vmul.f32 %v1859_v7, %v896_v17 }
 0x6ce   :  { %v1103_v52 = vrot.slane %v2101_v18, %v2038_v24 }
 0x6cf   :  { %v906_v23 = vpack.c.bf16 %v900_v21, %v899_v19  ;;  %v905_v25 = vpack.c.bf16 %v898_v22, %v897_v20  ;;  %v907_v34 = vpack.c.bf16 %v902_v31, %v901_v30  ;;  %v908_v35 = vpack.c.bf16 %v904_v33, %v903_v32 }
 0x6d1   :  { %1754 = vmatmul.mubr.msk.bf16.vlgmr.msra.gmra.mrb[12].mxu0 %vm289_vm3, %v906_v23  ;;  %1760 = vmatmul.mubr.msk.bf16.vlgmr.msra.gmra.mrb[12].mxu1 %vm289_vm3, %v905_v25 }
 0x6d2   :  { %1764 = vmatpush3.bf16.msra.mxu0 %v1003_v27  ;;  %1770 = vmatpush3.bf16.msra.mxu1 %v1052_v28 }
 0x6d3   :  { %1765 = vmatprep.mubr.msk.bf16.mxu0 %vm1941_vm0, %v1940_v0  ;;  %1771 = vmatprep.mubr.msk.bf16.mxu1 %vm1941_vm0, %v1940_v0 }
 0x6d4   :  { %1775 = vmatprep.subr.bf16.mxu0 %v1940_v0  ;;  %1781 = vmatprep.subr.bf16.mxu1 %v1940_v0 }
 0x6d9   :  { %1766 = vmatmul.mubr.msk.bf16.vlgmr.msra.gmra.mrb[16].mxu0 %vm289_vm3, %v907_v34  ;;  %1772 = vmatmul.mubr.msk.bf16.vlgmr.msra.gmra.mrb[16].mxu1 %vm289_vm3, %v908_v35 }
 0x6da   :  { %1777 = vmatprep.mubr.msk.bf16.mxu0 %vm1941_vm0, %v1940_v0  ;;  %1783 = vmatprep.mubr.msk.bf16.mxu1 %vm1941_vm0, %v1940_v0 }
 0x6db   :  { %1776 = vmatpush3.bf16.msra.mxu0 %v1821_v36  ;;  %v1139_v36 = vrot.slane %v2101_v18, %v2042_v26 }
 0x6dc   :  { %1787 = vmatprep.subr.bf16.mxu0 %v1940_v0 }
 0x7a4   :  { %v951_v38 = vpop.f32.mrb[12].mxu0  ;;  %v995_v39 = vpop.f32.mrb[12].mxu1 }
 0x7a5   :  { %v996_v40 = vadd.f32 %v995_v39, %v951_v38  ;;  %v1755_v41 = vpop.f32.mrb[13].mxu0  ;;  %v1761_v42 = vpop.f32.mrb[13].mxu1  ;;  %v1145_v38 = vrot.slane %v2101_v18, %v2046_v29 }
 0x7a6   :  { %v954_v44 = vpop.f32.mrb[14].mxu0  ;;  %v998_v45 = vpop.f32.mrb[14].mxu1 }
 0x7a7   :  { %v999_v46 = vadd.f32 %v998_v45, %v954_v44  ;;  %v1756_v47 = vpop.f32.mrb[15].mxu0  ;;  %v1762_v48 = vpop.f32.mrb[15].mxu1 }
 0x7a8   :  { %v1210_v47 = vpop.permute.xlu1 %1209 }
 0x7ac   :  { %v1042_v49 = vpop.f32.mrb[16].mxu0  ;;  %v1091_v50 = vpop.f32.mrb[16].mxu1 }
 0x7ad   :  { %v1049_v51 = vadd.f32 %v1042_v49, %v996_v40  ;;  %v1767_v53 = vpop.f32.mrb[17].mxu0  ;;  %v1773_v54 = vpop.f32.mrb[17].mxu1 }
 0x7ae   :  { %v1045_v55 = vpop.f32.mrb[18].mxu0  ;;  %v1094_v56 = vpop.f32.mrb[18].mxu1 }
 0x7af   :  { %v1098_v57 = vadd.f32 %v1091_v50, %v1049_v51  ;;  %v1050_v60 = vadd.f32 %v1045_v55, %v999_v46  ;;  %v1768_v61 = vpop.f32.mrb[19].mxu0  ;;  %v1774_v62 = vpop.f32.mrb[19].mxu1 }
 0x7b1   :  { %v1104_v63 = vadd.f32 %v1103_v52, %v1098_v57  ;;  %v1099_v1 = vadd.f32 %v1094_v56, %v1050_v60 }
 0x7b3   :  { %v1106_v2 = vmax.f32 %v1104_v63, 0.0  ;;  %v1105_v4 = vadd.f32 %v1103_v52, %v1099_v1 }
 0x7b5   :  { %v1107_v5 = vmax.f32 %v1105_v4, 0.0  ;;  %v1108_v6 = vsel %vm289_vm3, %v1106_v2, 0.0 }
 0x7b7   :  { %v1109_v7 = vsel %vm289_vm3, %v1107_v5, 0.0 }
 0x7b8   :  { %v1110_v8 = vadd.f32 %v1109_v7, %v1108_v6 }
 0x7ba   :  { %v1111_v10 = vrot.slane %v1110_v8, 4 }
 0x7bc   :  { %v1112_v11 = vadd.f32 %v1111_v10, %v1110_v8 }
 0x7be   :  { %v1113_v12 = vrot.slane %v1112_v11, 2 }
 0x7c0   :  { %v1114_v13 = vadd.f32 %v1113_v12, %v1112_v11 }
 0x7c2   :  { %v1115_v14 = vrot.slane %v1114_v13, 1 }
 0x7c4   :  { %v1116_v15 = vadd.f32 %v1115_v14, %v1114_v13 }
 0x7c6   :  { %v1117_v16 = vmul.f32 0.0625, %v1116_v15 }
 0x7c8   :  { %v1118_v17 = vsub.f32 %v1106_v2, %v1117_v16  ;;  %v1119_v19 = vsub.f32 %v1107_v5, %v1117_v16 }
 0x7ca   :  { %v1120_v20 = vmul.f32 %v1118_v17, %v1118_v17  ;;  %v1121_v21 = vmul.f32 %v1119_v19, %v1119_v19 }
 0x7cc   :  { %v1122_v22 = vsel %vm289_vm3, %v1120_v20, 0.0  ;;  %v1123_v23 = vsel %vm289_vm3, %v1121_v21, 0.0 }
 0x7cd   :  { %v1124_v25 = vadd.f32 %v1123_v23, %v1122_v22 }
 0x7cf   :  { %v1125_v27 = vrot.slane %v1124_v25, 4 }
 0x7d1   :  { %v1126_v28 = vadd.f32 %v1125_v27, %v1124_v25 }
 0x7d3   :  { %v1127_v30 = vrot.slane %v1126_v28, 2 }
 0x7d5   :  { %v1128_v31 = vadd.f32 %v1127_v30, %v1126_v28 }
 0x7d7   :  { %v1129_v32 = vrot.slane %v1128_v31, 1 }
 0x7d9   :  { %v1130_v33 = vadd.f32 %v1129_v32, %v1128_v31 }
 0x7db   :  { %v1131_v34 = vmul.f32 0.0625, %v1130_v33 }
 0x7dd   :  { %v1132_v35 = vadd.f32 1e-05, %v1131_v34 }
 0x7df   :  { %1864 = vrsqrt.f32 %v1132_v35 }
 0x7e9   :  { %v1865_v37 = vpop.eup %1864 }
 0x7ea   :  { %v1134_v39 = vmul.f32 %v1865_v37, %v1118_v17  ;;  %v1135_v40 = vmul.f32 %v1865_v37, %v1119_v19 }
 0x7ec   :  { %v1140_v41 = vmul.f32 %v1139_v36, %v1134_v39  ;;  %v1141_v42 = vmul.f32 %v1139_v36, %v1135_v40 }
 0x7ee   :  { %v1147_v44 = vadd.f32 %v1145_v38, %v1141_v42  ;;  %v1146_v45 = vadd.f32 %v1145_v38, %v1140_v41 }
 0x7f0   :  { %v1153_v46 = vpack.c.bf16 %v1147_v44, %v1146_v45 }
 0x7f2   :  { %1778 = vmatmul.mubr.msk.bf16.vlgmr.msra.gmra.mrb[20].mxu0 %vm289_vm3, %v1153_v46 }
 0x7f3   :  { %1789 = vmatprep.mubr.msk.bf16.mxu0 %vm1941_vm0, %v1940_v0 }
 0x8c5   :  { %v1197_v48 = vpop.f32.mrb[20].mxu0 }
 0x8c6   :  { %v1212_v49 = vadd.f32 %v1210_v47, %v1197_v48  ;;  %v1779_v50 = vpop.f32.mrb[21].mxu0 }
 0x8c7   :  { %v1200_v51 = vpop.f32.mrb[22].mxu0 }
 0x8c8   :  { %v1459_v52 = vpack.c.bf16 %v1200_v51, %v1197_v48  ;;  %1256 = vrot.lane.b32.xlu1 %v1212_v49, %s1944_s22  ;;  %v1780_v18 = vpop.f32.mrb[23].mxu0  ;;  %v1213_v53 = vadd.f32 %v1210_v47, %v1200_v51 }
 0x8ca   :  { %1788 = vmatpush3.bf16.msra.mxu0 %v1459_v52 }
 0x8cb   :  { %1799 = vmatprep.subr.bf16.mxu0 %v1940_v0 }
 0x8cc   :  { %1258 = vrot.lane.b32.xlu1 %v1213_v53, %s1944_s22 }
 0x8d0   :  { %1216 = vrot.lane.b32.xlu1 %v1197_v48, %s1944_s22 }
 0x8d4   :  { %1218 = vrot.lane.b32.xlu1 %v1200_v51, %s1944_s22 }
 0x93a   :  { %v1257_v54 = vpop.permute.xlu1 %1256 }
 0x93b   :  { %1262 = vxpose.xlu1.b32.start [1/2] (short) (narrow) %v1257_v54, 8 }
 0x93e   :  { %v1259_v55 = vpop.permute.xlu1 %1258 }
 0x93f   :  { %1263 = vxpose.xlu1.b32.end [2/2] (short) (narrow) %v1259_v55, 8 }
 0x942   :  { %v1217_v56 = vpop.permute.xlu1 %1216 }
 0x946   :  { %v1219_v57 = vpop.permute.xlu1 %1218 }
 0x9bb   :  { %v1278_v60 = vpop.trf.xlu1 }
 0x9bc   :  { %v1330_v61 = vrot.slane %v1278_v60, %v2046_v29  ;;  %v1297_v62 = vrot.slane %v1278_v60, %v2009_v3  ;;  %v1308_v63 = vrot.slane %v1278_v60, %v2038_v24  ;;  %v1319_v1 = vrot.slane %v1278_v60, %v2042_v26 }
 0x9be   :  { %1336 = vbcast.lane.b32.xlu1 %v1330_v61, 264  ;;  %1299 = vbcast.lane.b32.xlu0 %v1297_v62, 256 }
 0x9c2   :  { %1461 = vrot.lane.b32.xlu1 %v1459_v52, %s1947_s2  ;;  %1303 = vbcast.lane.b32.xlu0 %v1297_v62, 264 }
 0x9c6   :  { %1552 = vrot.lane.b32.xlu1 %v1459_v52, %s1942_s0  ;;  %1310 = vbcast.lane.b32.xlu0 %v1308_v63, 256 }
 0x9ca   :  { %1314 = vbcast.lane.b32.xlu0 %v1308_v63, 264 }
 0x9ce   :  { %1321 = vbcast.lane.b32.xlu0 %v1319_v1, 256 }
 0x9d2   :  { %1325 = vbcast.lane.b32.xlu0 %v1319_v1, 264 }
 0x9d6   :  { %1332 = vbcast.lane.b32.xlu0 %v1330_v61, 256 }
 0x9f4   :  { %1222 = vxpose.xlu0.b32.start [1/2] (short) (narrow) %v1217_v56, 8 }
 0x9f8   :  { %1223 = vxpose.xlu0.b32.end [2/2] (short) (narrow) %v1219_v57, 8 }
 0xa21   :  { %1601 = vrot.lane.b32.xlu0 %v1459_v52, %s1948_s28 }
 0xa30   :  { %v1337_v29 = vpop.permute.xlu1 %1336  ;;  %v1300_v4 = vpop.permute.xlu0 %1299 }
 0xa34   :  { %v1462_v2 = vpop.permute.xlu1 %1461  ;;  %v1304_v5 = vpop.permute.xlu0 %1303 }
 0xa35   :  { %1782 = vmatpush3.bf16.msra.mxu1 %v1462_v2 }
 0xa36   :  { %1793 = vmatprep.subr.bf16.mxu1 %v1940_v0 }
 0xa38   :  { %v1311_v6 = vpop.permute.xlu0 %1310 }
 0xa3c   :  { %v1315_v7 = vpop.permute.xlu0 %1314 }
 0xa40   :  { %v1322_v8 = vpop.permute.xlu0 %1321 }
 0xa44   :  { %v1326_v10 = vpop.permute.xlu0 %1325 }
 0xa48   :  { %v1333_v11 = vpop.permute.xlu0 %1332 }
 0xa74   :  { %v1238_v26 = vpop.trf.xlu0 }
 0xa75   :  { %v1345_v12 = vrot.slane %v1238_v26, %v2052_v43 }
 0xa77   :  { %v1346_v13 = vcombine.high %v1345_v12, %v1345_v12  ;;  %v1353_v14 = vrot.slane %v1345_v12, %v2052_v43 }
 0xa79   :  { %v1360_v15 = vrot.slane %v1346_v13, %v2052_v43  ;;  %v1361_v16 = vcombine.high %v1353_v14, %v1353_v14  ;;  %v1366_v17 = vrot.slane %v1353_v14, %v2009_v3 }
 0xa7b   :  { %v1362_v19 = vcombine.high %v1360_v15, %v1360_v15  ;;  %v1370_v20 = vrot.slane %v1360_v15, %v2009_v3  ;;  %v1374_v21 = vrot.slane %v1361_v16, %v2009_v3  ;;  %v1383_v22 = vsub.f32 %v1300_v4, %v1366_v17 }
 0xa7c   :  { %v1384_v23 = vsub.f32 %v1304_v5, %v1366_v17 }
 0xa7d   :  { %v1378_v25 = vrot.slane %v1362_v19, %v2009_v3  ;;  %v1385_v27 = vsub.f32 %v1311_v6, %v1370_v20  ;;  %v1386_v28 = vsub.f32 %v1315_v7, %v1370_v20  ;;  %v1387_v30 = vsub.f32 %v1322_v8, %v1374_v21 }
 0xa7e   :  { %v1388_v31 = vsub.f32 %v1326_v10, %v1374_v21  ;;  %v1391_v34 = vsel %vm289_vm3, %v1383_v22, -inf  ;;  %v1398_v35 = vsel %vm289_vm3, %v1384_v23, -inf }
 0xa7f   :  { %v1389_v32 = vsub.f32 %v1333_v11, %v1378_v25  ;;  %v1390_v33 = vsub.f32 %v1337_v29, %v1378_v25  ;;  %v1393_v43 = vsel %vm289_vm3, %v1387_v30, -inf  ;;  %v1392_v37 = vsel %vm289_vm3, %v1385_v27, -inf }
 0xa80   :  { %v1400_v36 = vsel %vm289_vm3, %v1388_v31, -inf  ;;  %v1399_v3 = vsel %vm289_vm3, %v1386_v28, -inf  ;;  %v1394_v40 = vmax.f32 %v1391_v34, %v1393_v43 }
 0xa81   :  { %v1395_v38 = vsel %vm289_vm3, %v1389_v32, -inf  ;;  %v1402_v39 = vsel %vm289_vm3, %v1390_v33, -inf  ;;  %v1401_v42 = vmax.f32 %v1398_v35, %v1400_v36  ;;  %v1553_v36 = vpop.permute.xlu1 %1552 }
 0xa82   :  { %v1396_v41 = vmax.f32 %v1392_v37, %v1395_v38  ;;  %v1403_v44 = vmax.f32 %v1399_v3, %v1402_v39 }
 0xa84   :  { %v1397_v45 = vmax.f32 %v1394_v40, %v1396_v41  ;;  %v1404_v46 = vmax.f32 %v1401_v42, %v1403_v44 }
 0xa86   :  { %v1405_v47 = vsub.f32 %v1383_v22, %v1397_v45  ;;  %v1406_v48 = vsub.f32 %v1384_v23, %v1404_v46  ;;  %v1407_v49 = vsub.f32 %v1385_v27, %v1397_v45  ;;  %v1408_v50 = vsub.f32 %v1386_v28, %v1404_v46 }
 0xa87   :  { %v1409_v51 = vsub.f32 %v1387_v30, %v1397_v45  ;;  %v1410_v52 = vsub.f32 %v1388_v31, %v1404_v46  ;;  %v1411_v18 = vsub.f32 %v1389_v32, %v1397_v45  ;;  %v1412_v56 = vsub.f32 %v1390_v33, %v1404_v46 }
 0xa88   :  { %v1413_v53 = vmul.f32 1.442695, %v1405_v47  ;;  %v1415_v54 = vmul.f32 1.442695, %v1406_v48  ;;  %v1417_v55 = vmul.f32 1.442695, %v1407_v49 }
 0xa89   :  { %v1419_v57 = vmul.f32 1.442695, %v1408_v50  ;;  %v1421_v60 = vmul.f32 1.442695, %v1409_v51  ;;  %v1423_v61 = vmul.f32 1.442695, %v1410_v52 }
 0xa8a   :  { %1866 = vpow2.f32 %v1413_v53  ;;  %v1425_v62 = vmul.f32 1.442695, %v1411_v18  ;;  %v1427_v63 = vmul.f32 1.442695, %v1412_v56  ;;  %v1653_v53 = vrot.slane %v2175_v9, %v2038_v24 }
 0xa8b   :  { %1868 = vpow2.f32 %v1415_v54 }
 0xa8c   :  { %1870 = vpow2.f32 %v1417_v55 }
 0xa8d   :  { %1872 = vpow2.f32 %v1419_v57 }
 0xa8e   :  { %1874 = vpow2.f32 %v1421_v60 }
 0xa8f   :  { %1876 = vpow2.f32 %v1423_v61 }
 0xa90   :  { %1878 = vpow2.f32 %v1425_v62 }
 0xa91   :  { %1880 = vpow2.f32 %v1427_v63 }
 0xa93   :  { %v1602_v37 = vpop.permute.xlu0 %1601 }
 0xa94   :  { %v1867_v1 = vpop.eup %1866 }
 0xa95   :  { %v1869_v29 = vpop.eup %1868  ;;  %v1429_v2 = vsel %vm289_vm3, %v1867_v1, 0.0 }
 0xa96   :  { %v1871_v4 = vpop.eup %1870  ;;  %v1436_v5 = vsel %vm289_vm3, %v1869_v29, 0.0 }
 0xa97   :  { %v1873_v6 = vpop.eup %1872  ;;  %v1430_v7 = vsel %vm289_vm3, %v1871_v4, 0.0 }
 0xa98   :  { %v1875_v8 = vpop.eup %1874  ;;  %v1431_v10 = vadd.f32 %v1430_v7, %v1429_v2  ;;  %v1437_v11 = vsel %vm289_vm3, %v1873_v6, 0.0 }
 0xa99   :  { %v1877_v26 = vpop.eup %1876  ;;  %v1432_v12 = vsel %vm289_vm3, %v1875_v8, 0.0  ;;  %v1438_v13 = vadd.f32 %v1437_v11, %v1436_v5 }
 0xa9a   :  { %v1879_v14 = vpop.eup %1878  ;;  %v1433_v15 = vadd.f32 %v1432_v12, %v1431_v10  ;;  %v1439_v16 = vsel %vm289_vm3, %v1877_v26, 0.0 }
 0xa9b   :  { %v1881_v17 = vpop.eup %1880  ;;  %v1434_v19 = vsel %vm289_vm3, %v1879_v14, 0.0  ;;  %v1440_v20 = vadd.f32 %v1439_v16, %v1438_v13 }
 0xa9c   :  { %v1435_v21 = vadd.f32 %v1434_v19, %v1433_v15  ;;  %v1441_v22 = vsel %vm289_vm3, %v1881_v17, 0.0 }
 0xa9d   :  { %v1442_v23 = vadd.f32 %v1441_v22, %v1440_v20 }
 0xa9e   :  { %1882 = vrcp.f32 %v1435_v21 }
 0xa9f   :  { %1884 = vrcp.f32 %v1442_v23 }
 0xaa8   :  { %v1883_v25 = vpop.eup %1882 }
 0xaa9   :  { %v1885_v27 = vpop.eup %1884  ;;  %v1445_v28 = vmul.f32 %v1883_v25, %v2077_v58 }
 0xaaa   :  { %v1446_v30 = vmul.f32 %v1885_v27, %v2079_v59 }
 0xaab   :  { %v1449_v31 = vmul.f32 %v1871_v4, %v1445_v28  ;;  %v1447_v32 = vmul.f32 %v1867_v1, %v1445_v28  ;;  %v1451_v38 = vmul.f32 %v1875_v8, %v1445_v28  ;;  %v1453_v59 = vmul.f32 %v1879_v14, %v1445_v28 }
 0xaac   :  { %v1450_v33 = vmul.f32 %v1873_v6, %v1446_v30  ;;  %v1448_v43 = vmul.f32 %v1869_v29, %v1446_v30  ;;  %v1452_v58 = vmul.f32 %v1877_v26, %v1446_v30  ;;  %v1454_v3 = vmul.f32 %v1881_v17, %v1446_v30 }
 0xaae   :  { %v1456_v34 = vpack.c.bf16 %v1450_v33, %v1449_v31  ;;  %v1455_v35 = vpack.c.bf16 %v1448_v43, %v1447_v32  ;;  %v1457_v39 = vpack.c.bf16 %v1452_v58, %v1451_v38  ;;  %v1458_v40 = vpack.c.bf16 %v1454_v3, %v1453_v59 }
 0xab0   :  { %1784 = vmatmul.mubr.msk.bf16.vlgmr.msra.gmra.mrb[20].mxu1 %vm289_vm3, %v1456_v34  ;;  %1790 = vmatmul.mubr.msk.bf16.vlgmr.msra.gmra.mrb[24].mxu0 %vm289_vm3, %v1455_v35 }
 0xab1   :  { %1794 = vmatpush3.bf16.msra.mxu1 %v1553_v36  ;;  %1800 = vmatpush3.bf16.msra.mxu0 %v1602_v37 }
 0xab2   :  { %1795 = vmatprep.mubr.msk.bf16.mxu1 %vm1941_vm0, %v1940_v0  ;;  %1801 = vmatprep.mubr.msk.bf16.mxu0 %vm1941_vm0, %v1940_v0 }
 0xab8   :  { %1796 = vmatmul.mubr.msk.bf16.vlgmr.msra.gmra.mrb[24].mxu1 %vm289_vm3, %v1457_v39  ;;  %1802 = vmatmul.mubr.msk.bf16.vlgmr.msra.gmra.mrb[28].mxu0 %vm289_vm3, %v1458_v40 }
 0xb83   :  { %v1501_v41 = vpop.f32.mrb[20].mxu1  ;;  %v1545_v42 = vpop.f32.mrb[24].mxu0 }
 0xb84   :  { %v1546_v44 = vadd.f32 %v1545_v42, %v1501_v41  ;;  %v1785_v45 = vpop.f32.mrb[21].mxu1  ;;  %v1791_v46 = vpop.f32.mrb[25].mxu0 }
 0xb85   :  { %v1504_v47 = vpop.f32.mrb[22].mxu1  ;;  %v1548_v48 = vpop.f32.mrb[26].mxu0 }
 0xb86   :  { %v1549_v49 = vadd.f32 %v1548_v48, %v1504_v47  ;;  %v1786_v50 = vpop.f32.mrb[23].mxu1  ;;  %v1792_v51 = vpop.f32.mrb[27].mxu0 }
 0xb8b   :  { %v1592_v0 = vpop.f32.mrb[24].mxu1  ;;  %v1641_v52 = vpop.f32.mrb[28].mxu0 }
 0xb8c   :  { %v1599_v18 = vadd.f32 %v1592_v0, %v1546_v44  ;;  %v1797_v54 = vpop.f32.mrb[25].mxu1  ;;  %v1803_v55 = vpop.f32.mrb[29].mxu0 }
 0xb8d   :  { %v1595_v56 = vpop.f32.mrb[26].mxu1  ;;  %v1644_v57 = vpop.f32.mrb[30].mxu0 }
 0xb8e   :  { %v1648_v60 = vadd.f32 %v1641_v52, %v1599_v18  ;;  %v1600_v61 = vadd.f32 %v1595_v56, %v1549_v49  ;;  %v1798_v62 = vpop.f32.mrb[27].mxu1  ;;  %v1804_v63 = vpop.f32.mrb[31].mxu0 }
 0xb90   :  { %v1654_v1 = vadd.f32 %v1653_v53, %v1648_v60  ;;  %v1649_v29 = vadd.f32 %v1644_v57, %v1600_v61 }
 0xb92   :  { %1656 = vst.msk [vmem:[%s2250_s4] sm:$0xff] %vm53_vm2, %v1654_v1  ;;  %v1655_v2 = vadd.f32 %v1653_v53, %v1649_v29 }
 0xb94   :  { %1657 = vst.msk [vmem:[%s2250_s4 + $0x8] sm:$0xff] %vm53_vm2, %v1655_v2 }
 0xb95   :  { %1662 = vsyncpa [#allocation3], 1 }
 0xb96   :  { %1663 = vsyncpa [#allocation5], 1 }

</bundles_post_ra>
